<compile_context>
chip_gen: v7x
topology: tpu7x:2x2x1
jax: 0.10.0
libtpu: 0.0.40
codegen_flags: <defaults>
</compile_context>

<pallas_src>
import functools
import math

import jax
import jax.numpy as jnp
from jax import lax
from jax.experimental import pallas as pl
from jax.experimental.pallas import tpu as pltpu

_POS_ALPHA = 0.0005

_MAX_GROUPS_PER_BLOCK = 16   # 16 groups * 2A(=8) rows = 128 sublanes -> one MXU tile
_L_TILE = 8192               # pixel (lane) tile for the reduction axis, multiple of 128
_BCE_BLOCK_ROWS = 1024       # 1024 x 128 f32 rows per BCE grid step


# --------------------------------------------------------------------------
# Pallas kernel 1: group-batched, L-tiled Gram + row sums for real_mi
#   input  x : (NG, RB, Lp)  bf16, RB = GB*2A rows = [mask(A) ; pred(A)] per group
#   output   : gram (NG, RB, RB) f32  = sum_l x x^T   (raw, un-centered)
#              rsum (NG, RB, 1)  f32  = sum_l x
# --------------------------------------------------------------------------
def _gram_kernel(x_ref, gram_ref, rsum_ref):
    @pl.when(pl.program_id(1) == 0)
    def _init():
        gram_ref[...] = jnp.zeros_like(gram_ref)
        rsum_ref[...] = jnp.zeros_like(rsum_ref)

    x = x_ref[0]                                   # (RB, LT) bf16
    dn = (((1,), (1,)), ((), ()))                  # contract over lanes: X @ X^T
    gram_ref[0] += lax.dot_general(x, x, dn, preferred_element_type=jnp.float32)
    rsum_ref[0] += jnp.sum(x.astype(jnp.float32), axis=-1, keepdims=True)


def _block_grams(x_blocks, lt):
    ng, rb, lp = x_blocks.shape
    nl = lp // lt
    return pl.pallas_call(
        _gram_kernel,
        out_shape=(jax.ShapeDtypeStruct((ng, rb, rb), jnp.float32),
                   jax.ShapeDtypeStruct((ng, rb, 1), jnp.float32)),
        grid=(ng, nl),
        in_specs=[pl.BlockSpec((1, rb, lt), lambda g, l: (g, 0, l))],
        out_specs=(pl.BlockSpec((1, rb, rb), lambda g, l: (g, 0, 0)),
                   pl.BlockSpec((1, rb, 1), lambda g, l: (g, 0, 0))),
        compiler_params=pltpu.CompilerParams(
            dimension_semantics=("parallel", "arbitrary"),
            vmem_limit_bytes=32 * 1024 * 1024),
    )(x_blocks)


# --------------------------------------------------------------------------
# Pallas kernel 2: class-weighted BCE, tiled row blocks, per-block lane partials
# --------------------------------------------------------------------------
def _bce_kernel(m_ref, p_ref, pos_ref, neg_ref, *, n_valid, block_rows):
    m = m_ref[...]
    p = jnp.clip(p_ref[...], 1e-7, 1.0 - 1e-7)
    # TODO(synk): keep both logs so soft (non-binary) masks stay correct; a single
    # where-selected log would halve EUP pressure for strictly binary masks.
    bce = -(m * jnp.log(p) + (1.0 - m) * jnp.log(1.0 - p))
    rows = lax.broadcasted_iota(jnp.int32, m.shape, 0) + pl.program_id(0) * block_rows
    lanes = lax.broadcasted_iota(jnp.int32, m.shape, 1)
    valid = (rows * 128 + lanes) < n_valid
    pos = jnp.where(valid, m * bce, 0.0)           # weighted by class_weight[1] outside
    neg = jnp.where(valid, (1.0 - m) * bce, 0.0)   # weighted by class_weight[0] outside
    pos_ref[...] = jnp.sum(pos, axis=0, keepdims=True)
    neg_ref[...] = jnp.sum(neg, axis=0, keepdims=True)


def _bce_with_class_balance(mask, pred, class_weight):
    # TODO(synk): exact loss.BCE_withClassBalance source is unavailable; this is a
    # per-pixel class-weighted BCE with mean reduction (w_map arg is None in forward).
    n = int(mask.size)
    m = mask.reshape(-1).astype(jnp.float32)
    p = pred.reshape(-1).astype(jnp.float32)
    r = -(-n // 128)
    if r * 128 != n:
        m = jnp.pad(m, (0, r * 128 - n))
        p = jnp.pad(p, (0, r * 128 - n))
    m2 = m.reshape(r, 128)
    p2 = p.reshape(r, 128)
    br = min(_BCE_BLOCK_ROWS, r)
    r_pad = ((r + br - 1) // br) * br
    if r_pad != r:
        m2 = jnp.pad(m2, ((0, r_pad - r), (0, 0)))
        p2 = jnp.pad(p2, ((0, r_pad - r), (0, 0)))
    nb = r_pad // br

    kernel = functools.partial(_bce_kernel, n_valid=n, block_rows=br)
    out = jax.ShapeDtypeStruct((nb, 128), jnp.float32)
    pos, neg = pl.pallas_call(
        kernel,
        out_shape=(out, out),
        grid=(nb,),
        in_specs=[pl.BlockSpec((br, 128), lambda i: (i, 0)),
                  pl.BlockSpec((br, 128), lambda i: (i, 0))],
        out_specs=(pl.BlockSpec((1, 128), lambda i: (i, 0)),
                   pl.BlockSpec((1, 128), lambda i: (i, 0))),
        compiler_params=pltpu.CompilerParams(dimension_semantics=("parallel",)),
    )(m2, p2)
    cw = class_weight.astype(jnp.float32).reshape(-1)
    return (cw[1] * jnp.sum(pos) + cw[0] * jnp.sum(neg)) * (1.0 / n)


# --------------------------------------------------------------------------
# Steerable pyramid (plain-JAX glue, FFT based)
# --------------------------------------------------------------------------
def _polar_grid(h, w):
    fy = (jnp.arange(h, dtype=jnp.float32) - h // 2) / (h / 2.0)
    fx = (jnp.arange(w, dtype=jnp.float32) - w // 2) / (w / 2.0)
    fy, fx = jnp.meshgrid(fy, fx, indexing="ij")
    rad = jnp.sqrt(fx * fx + fy * fy)
    angle = jnp.arctan2(fy, fx)
    return rad, angle


def _radial_masks(rad):
    log_rad = jnp.log2(jnp.maximum(rad, 1e-12))
    x = jnp.clip(log_rad, -1.0, 0.0)
    hi = jnp.cos(jnp.pi / 2.0 * (-x))
    lo = jnp.cos(jnp.pi / 2.0 * (x + 1.0))     # hi^2 + lo^2 = 1
    return hi, lo


def _angle_masks(angle, K):
    order = K - 1
    const = (2.0 ** (2 * order)) * (math.factorial(order) ** 2) / (K * math.factorial(2 * order))
    masks = []
    for k in range(K):
        a = jnp.mod(jnp.pi + angle - jnp.pi * k / K, 2.0 * jnp.pi) - jnp.pi
        m = 2.0 * math.sqrt(const) * (jnp.cos(a) ** order) * (jnp.abs(a) < jnp.pi / 2.0)
        masks.append(m.astype(jnp.float32))
    return masks


def steerable_pyramid_bands(x, N, K):
    # x: (B, C, H, W) real. Returns N oriented-band tensors, bands[i]: (B, C, K, H/2^i, W/2^i)
    # TODO(synk): reference ComplexSteerablePyramid source not provided; this is a standard
    # Simoncelli-style FFT construction (complex=False -> real part of oriented bands).
    Xf = jnp.fft.fftshift(jnp.fft.fft2(x.astype(jnp.complex64), axes=(-2, -1)), axes=(-2, -1))
    B, C, H, W = x.shape
    h, w = H, W
    rad, _ = _polar_grid(h, w)
    _, lo0 = _radial_masks(rad)
    cur = Xf * lo0
    bands = []
    for _ in range(N):
        rad, angle = _polar_grid(h, w)
        hi, lo = _radial_masks(rad)
        amasks = _angle_masks(angle, K)
        lvl = []
        for k in range(K):
            bf = cur * hi * amasks[k]
            band = jnp.fft.ifft2(jnp.fft.ifftshift(bf, axes=(-2, -1)), axes=(-2, -1))
            lvl.append(jnp.real(band).astype(jnp.float32))
        bands.append(jnp.stack(lvl, axis=2))   # (B, C, K, h, w)
        cur = cur * lo
        h2, w2 = h // 2, w // 2
        y0, x0 = h // 2 - h2 // 2, w // 2 - w2 // 2
        cur = cur[..., y0:y0 + h2, x0:x0 + w2] * ((h2 * w2) / (h * w))
        h, w = h2, w2
    return bands


# --------------------------------------------------------------------------
# real_mi (Pallas fused Gram + tiny A x A linear algebra in plain JAX)
# --------------------------------------------------------------------------
def _real_mi_mean(mask_band, pred_band):
    # TODO(synk): PyTorch reference runs this in float64; here the bands are bf16 into the
    # MXU with f32 accumulation, and the 4x4 inverse/Cholesky run in f32.
    B, C, A, H, W = mask_band.shape
    G, L = B * C, H * W
    m = mask_band.reshape(G, A, L)
    p = pred_band.reshape(G, A, L)
    x = jnp.concatenate([m, p], axis=1).astype(jnp.bfloat16)     # (G, 2A, L)

    gb = max(1, min(_MAX_GROUPS_PER_BLOCK, G))                   # groups per MXU pass
    g_pad = ((G + gb - 1) // gb) * gb
    if L <= _L_TILE:
        lt, l_pad = L, L
    else:
        lt = _L_TILE
        l_pad = ((L + lt - 1) // lt) * lt
    if g_pad != G or l_pad != L:
        x = jnp.pad(x, ((0, g_pad - G), (0, 0), (0, l_pad - L)))
    rb = gb * 2 * A
    x_blocks = x.reshape(g_pad // gb, rb, l_pad)

    gram, rsum = _block_grams(x_blocks, lt)                      # raw Gram + row sums
    # rank-1 mean correction (zero-padding along L/G contributes nothing; divide by true L)
    gram = gram - rsum * jnp.swapaxes(rsum, -1, -2) * (1.0 / L)

    # extract the per-group 8x8 diagonal blocks (cross-group blocks are discarded)
    g5 = gram.reshape(g_pad // gb, gb, 2 * A, gb, 2 * A)
    cov = jnp.diagonal(g5, axis1=1, axis2=3)                     # (NG, 2A, 2A, GB)
    cov = jnp.moveaxis(cov, -1, 1).reshape(g_pad, 2 * A, 2 * A)[:G]

    var_m = cov[:, :A, :A]
    var_p = cov[:, A:, A:]
    cov_mp = cov[:, :A, A:]
    eye = jnp.eye(A, dtype=jnp.float32)
    inv_cov_p = jnp.linalg.inv(var_p + eye * _POS_ALPHA)
    cond = var_m - cov_mp @ inv_cov_p @ jnp.swapaxes(cov_mp, -1, -2)
    chol = jnp.linalg.cholesky(cond)
    diag = jnp.diagonal(chol, axis1=-2, axis2=-1)
    mi = 2.0 * jnp.sum(jnp.log(diag + 1e-8), axis=-1)            # (G,) == flattened (B, C)
    return jnp.mean(mi)


# --------------------------------------------------------------------------
# CWMI_loss.forward  (complex=False, CW_method='MI', select=None)
# --------------------------------------------------------------------------
def cwmi_loss(mask, pred, w_map, class_weight, epoch=None, *, spN=4, spK=4, lamb=0.9):
    del w_map  # forward passes None into BCEW
    bce = _bce_with_class_balance(mask, pred, class_weight)
    if epoch == 0:
        return bce
    sp_mask = steerable_pyramid_bands(mask, spN, spK)
    sp_pred = steerable_pyramid_bands(pred, spN, spK)
    loss = bce * lamb
    for i in range(spN):
        loss = loss + _real_mi_mean(sp_mask[i], sp_pred[i])
    return loss


if __name__ == "__main__":
    key = jax.random.PRNGKey(0)
    k1, k2 = jax.random.split(key)
    B, C, H, W = 2, 1, 32, 32
    mask = (jax.random.uniform(k1, (B, C, H, W)) > 0.5).astype(jnp.float32)
    pred = jax.nn.sigmoid(jax.random.normal(k2, (B, C, H, W), dtype=jnp.float32))
    class_weight = jnp.array([0.4, 0.6], dtype=jnp.float32)

    loss_fn = jax.jit(cwmi_loss, static_argnames=("epoch", "spN", "spK", "lamb"))
    loss = loss_fn(mask, pred, None, class_weight, epoch=1)
    jax.block_until_ready(loss)
    print("KERNEL_OK")
</pallas_src>

<mosaic_0001>
module attributes {stable_mosaic.version = 11 : i64} {
  func.func @_bce_kernel(%arg0: i32, %arg1: memref<16x128xf32, #tpu.memory_space<vmem>>, %arg2: memref<16x128xf32, #tpu.memory_space<vmem>>, %arg3: memref<1x128xf32, #tpu.memory_space<vmem>>, %arg4: memref<1x128xf32, #tpu.memory_space<vmem>>) attributes {dimension_semantics = [#tpu.dimension_semantics<parallel>], iteration_bounds = array<i64: 1>, scalar_prefetch = 0 : i64, scratch_operands = 0 : i64, tpu.core_type = #tpu.core_type<tc>, window_params = [{transform_indices = @transform_0, window_bounds = array<i64: 16, 128>}, {transform_indices = @transform_1, window_bounds = array<i64: 16, 128>}, {transform_indices = @transform_2, window_bounds = array<i64: 1, 128>}, {transform_indices = @transform_3, window_bounds = array<i64: 1, 128>}]} {
    %c0 = arith.constant 0 : index
    %c0_0 = arith.constant 0 : index
    %0 = vector.load %arg1[%c0, %c0_0] : memref<16x128xf32, #tpu.memory_space<vmem>>, vector<16x128xf32>
    %c0_1 = arith.constant 0 : index
    %c0_2 = arith.constant 0 : index
    %1 = vector.load %arg2[%c0_1, %c0_2] : memref<16x128xf32, #tpu.memory_space<vmem>>, vector<16x128xf32>
    %cst = arith.constant 1.000000e-07 : f32
    %cst_3 = arith.constant 0.99999988 : f32
    %2 = vector.broadcast %cst : f32 to vector<16x128xf32>
    %3 = arith.maximumf %2, %1 : vector<16x128xf32>
    %4 = vector.broadcast %cst_3 : f32 to vector<16x128xf32>
    %5 = arith.minimumf %4, %3 : vector<16x128xf32>
    %6 = math.log %5 : vector<16x128xf32>
    %7 = arith.mulf %0, %6 : vector<16x128xf32>
    %cst_4 = arith.constant 1.000000e+00 : f32
    %8 = vector.broadcast %cst_4 : f32 to vector<16x128xf32>
    %9 = arith.subf %8, %0 : vector<16x128xf32>
    %cst_5 = arith.constant 1.000000e+00 : f32
    %10 = vector.broadcast %cst_5 : f32 to vector<16x128xf32>
    %11 = arith.subf %10, %5 : vector<16x128xf32>
    %12 = math.log %11 : vector<16x128xf32>
    %13 = arith.mulf %9, %12 : vector<16x128xf32>
    %14 = arith.addf %7, %13 : vector<16x128xf32>
    %cst_6 = arith.constant 0.000000e+00 : f32
    %15 = vector.broadcast %cst_6 : f32 to vector<16x128xf32>
    %16 = arith.subf %15, %14 : vector<16x128xf32>
    %17 = tpu.iota {dimensions = array<i32: 0>} : vector<16x128xi32>
    %c16_i32 = arith.constant 16 : i32
    %18 = arith.muli %arg0, %c16_i32 : i32
    %19 = vector.broadcast %18 : i32 to vector<16x128xi32>
    %20 = arith.addi %17, %19 : vector<16x128xi32>
    %21 = tpu.iota {dimensions = array<i32: 1>} : vector<16x128xi32>
    %c128_i32 = arith.constant 128 : i32
    %22 = vector.broadcast %c128_i32 : i32 to vector<16x128xi32>
    %23 = arith.muli %20, %22 : vector<16x128xi32>
    %24 = arith.addi %23, %21 : vector<16x128xi32>
    %c2048_i32 = arith.constant 2048 : i32
    %25 = vector.broadcast %c2048_i32 : i32 to vector<16x128xi32>
    %26 = arith.cmpi slt, %24, %25 : vector<16x128xi32>
    %27 = arith.mulf %0, %16 : vector<16x128xf32>
    %cst_7 = arith.constant 0.000000e+00 : f32
    %28 = vector.broadcast %cst_7 : f32 to vector<16x128xf32>
    %29 = arith.select %26, %27, %28 : vector<16x128xi1>, vector<16x128xf32>
    %cst_8 = arith.constant 1.000000e+00 : f32
    %30 = vector.broadcast %cst_8 : f32 to vector<16x128xf32>
    %31 = arith.subf %30, %0 : vector<16x128xf32>
    %32 = arith.mulf %31, %16 : vector<16x128xf32>
    %cst_9 = arith.constant 0.000000e+00 : f32
    %33 = vector.broadcast %cst_9 : f32 to vector<16x128xf32>
    %34 = arith.select %26, %32, %33 : vector<16x128xi1>, vector<16x128xf32>
    %cst_10 = arith.constant dense<0.000000e+00> : vector<128xf32>
    %35 = vector.multi_reduction <add>, %29, %cst_10 [0] : vector<16x128xf32> to vector<128xf32>
    %36 = vector.shape_cast %35 : vector<128xf32> to vector<1x128xf32>
    %c0_11 = arith.constant 0 : index
    %c0_12 = arith.constant 0 : index
    %37 = vector.load %arg3[%c0_11, %c0_12] : memref<1x128xf32, #tpu.memory_space<vmem>>, vector<1x128xf32>
    tpu.vector_store %arg3[%c0_11, %c0_12], %36 {strides = array<i32>} : memref<1x128xf32, #tpu.memory_space<vmem>>, vector<1x128xf32>,
    %cst_13 = arith.constant dense<0.000000e+00> : vector<128xf32>
    %38 = vector.multi_reduction <add>, %34, %cst_13 [0] : vector<16x128xf32> to vector<128xf32>
    %39 = vector.shape_cast %38 : vector<128xf32> to vector<1x128xf32>
    %c0_14 = arith.constant 0 : index
    %c0_15 = arith.constant 0 : index
    %40 = vector.load %arg4[%c0_14, %c0_15] : memref<1x128xf32, #tpu.memory_space<vmem>>, vector<1x128xf32>
    tpu.vector_store %arg4[%c0_14, %c0_15], %39 {strides = array<i32>} : memref<1x128xf32, #tpu.memory_space<vmem>>, vector<1x128xf32>,
    return
  }
  func.func @transform_0(%arg0: i32) -> (i32, i32) {
    %c0_i32 = arith.constant 0 : i32
    %c0_i32_0 = arith.constant 0 : i32
    return %arg0, %c0_i32 : i32, i32
  }
  func.func @transform_1(%arg0: i32) -> (i32, i32) {
    %c0_i32 = arith.constant 0 : i32
    %c0_i32_0 = arith.constant 0 : i32
    return %arg0, %c0_i32 : i32, i32
  }
  func.func @transform_2(%arg0: i32) -> (i32, i32) {
    %c0_i32 = arith.constant 0 : i32
    %c0_i32_0 = arith.constant 0 : i32
    return %arg0, %c0_i32 : i32, i32
  }
  func.func @transform_3(%arg0: i32) -> (i32, i32) {
    %c0_i32 = arith.constant 0 : i32
    %c0_i32_0 = arith.constant 0 : i32
    return %arg0, %c0_i32 : i32, i32
  }
}

module attributes {stable_mosaic.version = 11 : i64} {
  func.func @_gram_kernel(%arg0: i32, %arg1: i32, %arg2: memref<1x16x64xbf16, #tpu.memory_space<vmem>>, %arg3: memref<1x16x16xf32, #tpu.memory_space<vmem>>, %arg4: memref<1x16x1xf32, #tpu.memory_space<vmem>>) attributes {dimension_semantics = [#tpu.dimension_semantics<parallel>, #tpu.dimension_semantics<arbitrary>], iteration_bounds = array<i64: 1, 1>, scalar_prefetch = 0 : i64, scratch_operands = 0 : i64, tpu.core_type = #tpu.core_type<tc>, window_params = [{transform_indices = @transform_0, window_bounds = array<i64: 1, 16, 64>}, {transform_indices = @transform_1, window_bounds = array<i64: 1, 16, 16>}, {transform_indices = @transform_2, window_bounds = array<i64: 1, 16, 1>}]} {
    %c0_i32 = arith.constant 0 : i32
    %0 = arith.cmpi eq, %arg1, %c0_i32 : i32
    %1 = arith.extui %0 : i1 to i32
    %c0_i32_0 = arith.constant 0 : i32
    %2 = arith.cmpi ne, %1, %c0_i32_0 : i32
    scf.if %2 {
      %cst_16 = arith.constant 0.000000e+00 : f32
      %21 = vector.broadcast %cst_16 : f32 to vector<1x16x16xf32>
      %c0_17 = arith.constant 0 : index
      %c0_18 = arith.constant 0 : index
      %c0_19 = arith.constant 0 : index
      %22 = vector.load %arg3[%c0_17, %c0_18, %c0_19] : memref<1x16x16xf32, #tpu.memory_space<vmem>>, vector<1x16x16xf32>
      tpu.vector_store %arg3[%c0_17, %c0_18, %c0_19], %21 {strides = array<i32>} : memref<1x16x16xf32, #tpu.memory_space<vmem>>, vector<1x16x16xf32>,
      %cst_20 = arith.constant 0.000000e+00 : f32
      %23 = vector.broadcast %cst_20 : f32 to vector<1x16x1xf32>
      %c0_21 = arith.constant 0 : index
      %c0_22 = arith.constant 0 : index
      %c0_23 = arith.constant 0 : index
      %24 = vector.load %arg4[%c0_21, %c0_22, %c0_23] : memref<1x16x1xf32, #tpu.memory_space<vmem>>, vector<1x16x1xf32>
      tpu.vector_store %arg4[%c0_21, %c0_22, %c0_23], %23 {strides = array<i32>} : memref<1x16x1xf32, #tpu.memory_space<vmem>>, vector<1x16x1xf32>,
    } else {
    }
    %c0 = arith.constant 0 : index
    %c0_1 = arith.constant 0 : index
    %c0_2 = arith.constant 0 : index
    %3 = vector.load %arg2[%c0, %c0_1, %c0_2] : memref<1x16x64xbf16, #tpu.memory_space<vmem>>, vector<1x16x64xbf16>
    %4 = vector.shape_cast %3 : vector<1x16x64xbf16> to vector<16x64xbf16>
    %c0_3 = arith.constant 0 : index
    %c0_4 = arith.constant 0 : index
    %c0_5 = arith.constant 0 : index
    %5 = vector.load %arg3[%c0_3, %c0_4, %c0_5] : memref<1x16x16xf32, #tpu.memory_space<vmem>>, vector<1x16x16xf32>
    %6 = vector.shape_cast %5 : vector<1x16x16xf32> to vector<16x16xf32>
    %cst = arith.constant dense<0.000000e+00> : vector<16x16xf32>
    %7 = tpu.matmul %4, %4, %cst {dimension_numbers = #tpu.dot_dimension_numbers<[1], [1], [0], [0], [0, 0, 1, 0], [], []>} : vector<16x64xbf16>, vector<16x64xbf16>, vector<16x16xf32> -> vector<16x16xf32>
    %8 = arith.addf %6, %7 : vector<16x16xf32>
    %c0_6 = arith.constant 0 : index
    %c0_7 = arith.constant 0 : index
    %c0_8 = arith.constant 0 : index
    %9 = vector.load %arg3[%c0_6, %c0_7, %c0_8] : memref<1x16x16xf32, #tpu.memory_space<vmem>>, vector<1x16x16xf32>
    %10 = vector.shape_cast %9 : vector<1x16x16xf32> to vector<16x16xf32>
    %11 = vector.shape_cast %8 : vector<16x16xf32> to vector<1x16x16xf32>
    tpu.vector_store %arg3[%c0_6, %c0_7, %c0_8], %11 {strides = array<i32>} : memref<1x16x16xf32, #tpu.memory_space<vmem>>, vector<1x16x16xf32>,
    %c0_9 = arith.constant 0 : index
    %c0_10 = arith.constant 0 : index
    %c0_11 = arith.constant 0 : index
    %12 = vector.load %arg4[%c0_9, %c0_10, %c0_11] : memref<1x16x1xf32, #tpu.memory_space<vmem>>, vector<1x16x1xf32>
    %13 = vector.shape_cast %12 : vector<1x16x1xf32> to vector<16x1xf32>
    %14 = arith.extf %4 : vector<16x64xbf16> to vector<16x64xf32>
    %cst_12 = arith.constant dense<0.000000e+00> : vector<16xf32>
    %15 = vector.multi_reduction <add>, %14, %cst_12 [1] : vector<16x64xf32> to vector<16xf32>
    %16 = vector.shape_cast %15 : vector<16xf32> to vector<16x1xf32>
    %17 = arith.addf %13, %16 : vector<16x1xf32>
    %c0_13 = arith.constant 0 : index
    %c0_14 = arith.constant 0 : index
    %c0_15 = arith.constant 0 : index
    %18 = vector.load %arg4[%c0_13, %c0_14, %c0_15] : memref<1x16x1xf32, #tpu.memory_space<vmem>>, vector<1x16x1xf32>
    %19 = vector.shape_cast %18 : vector<1x16x1xf32> to vector<16x1xf32>
    %20 = vector.shape_cast %17 : vector<16x1xf32> to vector<1x16x1xf32>
    tpu.vector_store %arg4[%c0_13, %c0_14, %c0_15], %20 {strides = array<i32>} : memref<1x16x1xf32, #tpu.memory_space<vmem>>, vector<1x16x1xf32>,
    return
  }
  func.func @transform_0(%arg0: i32, %arg1: i32) -> (i32, i32, i32) {
    %c0_i32 = arith.constant 0 : i32
    %c0_i32_0 = arith.constant 0 : i32
    return %arg0, %c0_i32, %arg1 : i32, i32, i32
  }
  func.func @transform_1(%arg0: i32, %arg1: i32) -> (i32, i32, i32) {
    %c0_i32 = arith.constant 0 : i32
    %c0_i32_0 = arith.constant 0 : i32
    %c0_i32_1 = arith.constant 0 : i32
    return %arg0, %c0_i32, %c0_i32_0 : i32, i32, i32
  }
  func.func @transform_2(%arg0: i32, %arg1: i32) -> (i32, i32, i32) {
    %c0_i32 = arith.constant 0 : i32
    %c0_i32_0 = arith.constant 0 : i32
    %c0_i32_1 = arith.constant 0 : i32
    return %arg0, %c0_i32, %c0_i32_0 : i32, i32, i32
  }
}

module attributes {stable_mosaic.version = 11 : i64} {
  func.func @_gram_kernel(%arg0: i32, %arg1: i32, %arg2: memref<1x16x256xbf16, #tpu.memory_space<vmem>>, %arg3: memref<1x16x16xf32, #tpu.memory_space<vmem>>, %arg4: memref<1x16x1xf32, #tpu.memory_space<vmem>>) attributes {dimension_semantics = [#tpu.dimension_semantics<parallel>, #tpu.dimension_semantics<arbitrary>], iteration_bounds = array<i64: 1, 1>, scalar_prefetch = 0 : i64, scratch_operands = 0 : i64, tpu.core_type = #tpu.core_type<tc>, window_params = [{transform_indices = @transform_0, window_bounds = array<i64: 1, 16, 256>}, {transform_indices = @transform_1, window_bounds = array<i64: 1, 16, 16>}, {transform_indices = @transform_2, window_bounds = array<i64: 1, 16, 1>}]} {
    %c0_i32 = arith.constant 0 : i32
    %0 = arith.cmpi eq, %arg1, %c0_i32 : i32
    %1 = arith.extui %0 : i1 to i32
    %c0_i32_0 = arith.constant 0 : i32
    %2 = arith.cmpi ne, %1, %c0_i32_0 : i32
    scf.if %2 {
      %cst_16 = arith.constant 0.000000e+00 : f32
      %21 = vector.broadcast %cst_16 : f32 to vector<1x16x16xf32>
      %c0_17 = arith.constant 0 : index
      %c0_18 = arith.constant 0 : index
      %c0_19 = arith.constant 0 : index
      %22 = vector.load %arg3[%c0_17, %c0_18, %c0_19] : memref<1x16x16xf32, #tpu.memory_space<vmem>>, vector<1x16x16xf32>
      tpu.vector_store %arg3[%c0_17, %c0_18, %c0_19], %21 {strides = array<i32>} : memref<1x16x16xf32, #tpu.memory_space<vmem>>, vector<1x16x16xf32>,
      %cst_20 = arith.constant 0.000000e+00 : f32
      %23 = vector.broadcast %cst_20 : f32 to vector<1x16x1xf32>
      %c0_21 = arith.constant 0 : index
      %c0_22 = arith.constant 0 : index
      %c0_23 = arith.constant 0 : index
      %24 = vector.load %arg4[%c0_21, %c0_22, %c0_23] : memref<1x16x1xf32, #tpu.memory_space<vmem>>, vector<1x16x1xf32>
      tpu.vector_store %arg4[%c0_21, %c0_22, %c0_23], %23 {strides = array<i32>} : memref<1x16x1xf32, #tpu.memory_space<vmem>>, vector<1x16x1xf32>,
    } else {
    }
    %c0 = arith.constant 0 : index
    %c0_1 = arith.constant 0 : index
    %c0_2 = arith.constant 0 : index
    %3 = vector.load %arg2[%c0, %c0_1, %c0_2] : memref<1x16x256xbf16, #tpu.memory_space<vmem>>, vector<1x16x256xbf16>
    %4 = vector.shape_cast %3 : vector<1x16x256xbf16> to vector<16x256xbf16>
    %c0_3 = arith.constant 0 : index
    %c0_4 = arith.constant 0 : index
    %c0_5 = arith.constant 0 : index
    %5 = vector.load %arg3[%c0_3, %c0_4, %c0_5] : memref<1x16x16xf32, #tpu.memory_space<vmem>>, vector<1x16x16xf32>
    %6 = vector.shape_cast %5 : vector<1x16x16xf32> to vector<16x16xf32>
    %cst = arith.constant dense<0.000000e+00> : vector<16x16xf32>
    %7 = tpu.matmul %4, %4, %cst {dimension_numbers = #tpu.dot_dimension_numbers<[1], [1], [0], [0], [0, 0, 1, 0], [], []>} : vector<16x256xbf16>, vector<16x256xbf16>, vector<16x16xf32> -> vector<16x16xf32>
    %8 = arith.addf %6, %7 : vector<16x16xf32>
    %c0_6 = arith.constant 0 : index
    %c0_7 = arith.constant 0 : index
    %c0_8 = arith.constant 0 : index
    %9 = vector.load %arg3[%c0_6, %c0_7, %c0_8] : memref<1x16x16xf32, #tpu.memory_space<vmem>>, vector<1x16x16xf32>
    %10 = vector.shape_cast %9 : vector<1x16x16xf32> to vector<16x16xf32>
    %11 = vector.shape_cast %8 : vector<16x16xf32> to vector<1x16x16xf32>
    tpu.vector_store %arg3[%c0_6, %c0_7, %c0_8], %11 {strides = array<i32>} : memref<1x16x16xf32, #tpu.memory_space<vmem>>, vector<1x16x16xf32>,
    %c0_9 = arith.constant 0 : index
    %c0_10 = arith.constant 0 : index
    %c0_11 = arith.constant 0 : index
    %12 = vector.load %arg4[%c0_9, %c0_10, %c0_11] : memref<1x16x1xf32, #tpu.memory_space<vmem>>, vector<1x16x1xf32>
    %13 = vector.shape_cast %12 : vector<1x16x1xf32> to vector<16x1xf32>
    %14 = arith.extf %4 : vector<16x256xbf16> to vector<16x256xf32>
    %cst_12 = arith.constant dense<0.000000e+00> : vector<16xf32>
    %15 = vector.multi_reduction <add>, %14, %cst_12 [1] : vector<16x256xf32> to vector<16xf32>
    %16 = vector.shape_cast %15 : vector<16xf32> to vector<16x1xf32>
    %17 = arith.addf %13, %16 : vector<16x1xf32>
    %c0_13 = arith.constant 0 : index
    %c0_14 = arith.constant 0 : index
    %c0_15 = arith.constant 0 : index
    %18 = vector.load %arg4[%c0_13, %c0_14, %c0_15] : memref<1x16x1xf32, #tpu.memory_space<vmem>>, vector<1x16x1xf32>
    %19 = vector.shape_cast %18 : vector<1x16x1xf32> to vector<16x1xf32>
    %20 = vector.shape_cast %17 : vector<16x1xf32> to vector<1x16x1xf32>
    tpu.vector_store %arg4[%c0_13, %c0_14, %c0_15], %20 {strides = array<i32>} : memref<1x16x1xf32, #tpu.memory_space<vmem>>, vector<1x16x1xf32>,
    return
  }
  func.func @transform_0(%arg0: i32, %arg1: i32) -> (i32, i32, i32) {
    %c0_i32 = arith.constant 0 : i32
    %c0_i32_0 = arith.constant 0 : i32
    return %arg0, %c0_i32, %arg1 : i32, i32, i32
  }
  func.func @transform_1(%arg0: i32, %arg1: i32) -> (i32, i32, i32) {
    %c0_i32 = arith.constant 0 : i32
    %c0_i32_0 = arith.constant 0 : i32
    %c0_i32_1 = arith.constant 0 : i32
    return %arg0, %c0_i32, %c0_i32_0 : i32, i32, i32
  }
  func.func @transform_2(%arg0: i32, %arg1: i32) -> (i32, i32, i32) {
    %c0_i32 = arith.constant 0 : i32
    %c0_i32_0 = arith.constant 0 : i32
    %c0_i32_1 = arith.constant 0 : i32
    return %arg0, %c0_i32, %c0_i32_0 : i32, i32, i32
  }
}

module attributes {stable_mosaic.version = 11 : i64} {
  func.func @_gram_kernel(%arg0: i32, %arg1: i32, %arg2: memref<1x16x16xbf16, #tpu.memory_space<vmem>>, %arg3: memref<1x16x16xf32, #tpu.memory_space<vmem>>, %arg4: memref<1x16x1xf32, #tpu.memory_space<vmem>>) attributes {dimension_semantics = [#tpu.dimension_semantics<parallel>, #tpu.dimension_semantics<arbitrary>], iteration_bounds = array<i64: 1, 1>, scalar_prefetch = 0 : i64, scratch_operands = 0 : i64, tpu.core_type = #tpu.core_type<tc>, window_params = [{transform_indices = @transform_0, window_bounds = array<i64: 1, 16, 16>}, {transform_indices = @transform_1, window_bounds = array<i64: 1, 16, 16>}, {transform_indices = @transform_2, window_bounds = array<i64: 1, 16, 1>}]} {
    %c0_i32 = arith.constant 0 : i32
    %0 = arith.cmpi eq, %arg1, %c0_i32 : i32
    %1 = arith.extui %0 : i1 to i32
    %c0_i32_0 = arith.constant 0 : i32
    %2 = arith.cmpi ne, %1, %c0_i32_0 : i32
    scf.if %2 {
      %cst_16 = arith.constant 0.000000e+00 : f32
      %21 = vector.broadcast %cst_16 : f32 to vector<1x16x16xf32>
      %c0_17 = arith.constant 0 : index
      %c0_18 = arith.constant 0 : index
      %c0_19 = arith.constant 0 : index
      %22 = vector.load %arg3[%c0_17, %c0_18, %c0_19] : memref<1x16x16xf32, #tpu.memory_space<vmem>>, vector<1x16x16xf32>
      tpu.vector_store %arg3[%c0_17, %c0_18, %c0_19], %21 {strides = array<i32>} : memref<1x16x16xf32, #tpu.memory_space<vmem>>, vector<1x16x16xf32>,
      %cst_20 = arith.constant 0.000000e+00 : f32
      %23 = vector.broadcast %cst_20 : f32 to vector<1x16x1xf32>
      %c0_21 = arith.constant 0 : index
      %c0_22 = arith.constant 0 : index
      %c0_23 = arith.constant 0 : index
      %24 = vector.load %arg4[%c0_21, %c0_22, %c0_23] : memref<1x16x1xf32, #tpu.memory_space<vmem>>, vector<1x16x1xf32>
      tpu.vector_store %arg4[%c0_21, %c0_22, %c0_23], %23 {strides = array<i32>} : memref<1x16x1xf32, #tpu.memory_space<vmem>>, vector<1x16x1xf32>,
    } else {
    }
    %c0 = arith.constant 0 : index
    %c0_1 = arith.constant 0 : index
    %c0_2 = arith.constant 0 : index
    %3 = vector.load %arg2[%c0, %c0_1, %c0_2] : memref<1x16x16xbf16, #tpu.memory_space<vmem>>, vector<1x16x16xbf16>
    %4 = vector.shape_cast %3 : vector<1x16x16xbf16> to vector<16x16xbf16>
    %c0_3 = arith.constant 0 : index
    %c0_4 = arith.constant 0 : index
    %c0_5 = arith.constant 0 : index
    %5 = vector.load %arg3[%c0_3, %c0_4, %c0_5] : memref<1x16x16xf32, #tpu.memory_space<vmem>>, vector<1x16x16xf32>
    %6 = vector.shape_cast %5 : vector<1x16x16xf32> to vector<16x16xf32>
    %cst = arith.constant dense<0.000000e+00> : vector<16x16xf32>
    %7 = tpu.matmul %4, %4, %cst {dimension_numbers = #tpu.dot_dimension_numbers<[1], [1], [0], [0], [0, 0, 1, 0], [], []>} : vector<16x16xbf16>, vector<16x16xbf16>, vector<16x16xf32> -> vector<16x16xf32>
    %8 = arith.addf %6, %7 : vector<16x16xf32>
    %c0_6 = arith.constant 0 : index
    %c0_7 = arith.constant 0 : index
    %c0_8 = arith.constant 0 : index
    %9 = vector.load %arg3[%c0_6, %c0_7, %c0_8] : memref<1x16x16xf32, #tpu.memory_space<vmem>>, vector<1x16x16xf32>
    %10 = vector.shape_cast %9 : vector<1x16x16xf32> to vector<16x16xf32>
    %11 = vector.shape_cast %8 : vector<16x16xf32> to vector<1x16x16xf32>
    tpu.vector_store %arg3[%c0_6, %c0_7, %c0_8], %11 {strides = array<i32>} : memref<1x16x16xf32, #tpu.memory_space<vmem>>, vector<1x16x16xf32>,
    %c0_9 = arith.constant 0 : index
    %c0_10 = arith.constant 0 : index
    %c0_11 = arith.constant 0 : index
    %12 = vector.load %arg4[%c0_9, %c0_10, %c0_11] : memref<1x16x1xf32, #tpu.memory_space<vmem>>, vector<1x16x1xf32>
    %13 = vector.shape_cast %12 : vector<1x16x1xf32> to vector<16x1xf32>
    %14 = arith.extf %4 : vector<16x16xbf16> to vector<16x16xf32>
    %cst_12 = arith.constant dense<0.000000e+00> : vector<16xf32>
    %15 = vector.multi_reduction <add>, %14, %cst_12 [1] : vector<16x16xf32> to vector<16xf32>
    %16 = vector.shape_cast %15 : vector<16xf32> to vector<16x1xf32>
    %17 = arith.addf %13, %16 : vector<16x1xf32>
    %c0_13 = arith.constant 0 : index
    %c0_14 = arith.constant 0 : index
    %c0_15 = arith.constant 0 : index
    %18 = vector.load %arg4[%c0_13, %c0_14, %c0_15] : memref<1x16x1xf32, #tpu.memory_space<vmem>>, vector<1x16x1xf32>
    %19 = vector.shape_cast %18 : vector<1x16x1xf32> to vector<16x1xf32>
    %20 = vector.shape_cast %17 : vector<16x1xf32> to vector<1x16x1xf32>
    tpu.vector_store %arg4[%c0_13, %c0_14, %c0_15], %20 {strides = array<i32>} : memref<1x16x1xf32, #tpu.memory_space<vmem>>, vector<1x16x1xf32>,
    return
  }
  func.func @transform_0(%arg0: i32, %arg1: i32) -> (i32, i32, i32) {
    %c0_i32 = arith.constant 0 : i32
    %c0_i32_0 = arith.constant 0 : i32
    return %arg0, %c0_i32, %arg1 : i32, i32, i32
  }
  func.func @transform_1(%arg0: i32, %arg1: i32) -> (i32, i32, i32) {
    %c0_i32 = arith.constant 0 : i32
    %c0_i32_0 = arith.constant 0 : i32
    %c0_i32_1 = arith.constant 0 : i32
    return %arg0, %c0_i32, %c0_i32_0 : i32, i32, i32
  }
  func.func @transform_2(%arg0: i32, %arg1: i32) -> (i32, i32, i32) {
    %c0_i32 = arith.constant 0 : i32
    %c0_i32_0 = arith.constant 0 : i32
    %c0_i32_1 = arith.constant 0 : i32
    return %arg0, %c0_i32, %c0_i32_0 : i32, i32, i32
  }
}

module attributes {stable_mosaic.version = 11 : i64} {
  func.func @_gram_kernel(%arg0: i32, %arg1: i32, %arg2: memref<1x16x1024xbf16, #tpu.memory_space<vmem>>, %arg3: memref<1x16x16xf32, #tpu.memory_space<vmem>>, %arg4: memref<1x16x1xf32, #tpu.memory_space<vmem>>) attributes {dimension_semantics = [#tpu.dimension_semantics<parallel>, #tpu.dimension_semantics<arbitrary>], iteration_bounds = array<i64: 1, 1>, scalar_prefetch = 0 : i64, scratch_operands = 0 : i64, tpu.core_type = #tpu.core_type<tc>, window_params = [{transform_indices = @transform_0, window_bounds = array<i64: 1, 16, 1024>}, {transform_indices = @transform_1, window_bounds = array<i64: 1, 16, 16>}, {transform_indices = @transform_2, window_bounds = array<i64: 1, 16, 1>}]} {
    %c0_i32 = arith.constant 0 : i32
    %0 = arith.cmpi eq, %arg1, %c0_i32 : i32
    %1 = arith.extui %0 : i1 to i32
    %c0_i32_0 = arith.constant 0 : i32
    %2 = arith.cmpi ne, %1, %c0_i32_0 : i32
    scf.if %2 {
      %cst_16 = arith.constant 0.000000e+00 : f32
      %21 = vector.broadcast %cst_16 : f32 to vector<1x16x16xf32>
      %c0_17 = arith.constant 0 : index
      %c0_18 = arith.constant 0 : index
      %c0_19 = arith.constant 0 : index
      %22 = vector.load %arg3[%c0_17, %c0_18, %c0_19] : memref<1x16x16xf32, #tpu.memory_space<vmem>>, vector<1x16x16xf32>
      tpu.vector_store %arg3[%c0_17, %c0_18, %c0_19], %21 {strides = array<i32>} : memref<1x16x16xf32, #tpu.memory_space<vmem>>, vector<1x16x16xf32>,
      %cst_20 = arith.constant 0.000000e+00 : f32
      %23 = vector.broadcast %cst_20 : f32 to vector<1x16x1xf32>
      %c0_21 = arith.constant 0 : index
      %c0_22 = arith.constant 0 : index
      %c0_23 = arith.constant 0 : index
      %24 = vector.load %arg4[%c0_21, %c0_22, %c0_23] : memref<1x16x1xf32, #tpu.memory_space<vmem>>, vector<1x16x1xf32>
      tpu.vector_store %arg4[%c0_21, %c0_22, %c0_23], %23 {strides = array<i32>} : memref<1x16x1xf32, #tpu.memory_space<vmem>>, vector<1x16x1xf32>,
    } else {
    }
    %c0 = arith.constant 0 : index
    %c0_1 = arith.constant 0 : index
    %c0_2 = arith.constant 0 : index
    %3 = vector.load %arg2[%c0, %c0_1, %c0_2] : memref<1x16x1024xbf16, #tpu.memory_space<vmem>>, vector<1x16x1024xbf16>
    %4 = vector.shape_cast %3 : vector<1x16x1024xbf16> to vector<16x1024xbf16>
    %c0_3 = arith.constant 0 : index
    %c0_4 = arith.constant 0 : index
    %c0_5 = arith.constant 0 : index
    %5 = vector.load %arg3[%c0_3, %c0_4, %c0_5] : memref<1x16x16xf32, #tpu.memory_space<vmem>>, vector<1x16x16xf32>
    %6 = vector.shape_cast %5 : vector<1x16x16xf32> to vector<16x16xf32>
    %cst = arith.constant dense<0.000000e+00> : vector<16x16xf32>
    %7 = tpu.matmul %4, %4, %cst {dimension_numbers = #tpu.dot_dimension_numbers<[1], [1], [0], [0], [0, 0, 1, 0], [], []>} : vector<16x1024xbf16>, vector<16x1024xbf16>, vector<16x16xf32> -> vector<16x16xf32>
    %8 = arith.addf %6, %7 : vector<16x16xf32>
    %c0_6 = arith.constant 0 : index
    %c0_7 = arith.constant 0 : index
    %c0_8 = arith.constant 0 : index
    %9 = vector.load %arg3[%c0_6, %c0_7, %c0_8] : memref<1x16x16xf32, #tpu.memory_space<vmem>>, vector<1x16x16xf32>
    %10 = vector.shape_cast %9 : vector<1x16x16xf32> to vector<16x16xf32>
    %11 = vector.shape_cast %8 : vector<16x16xf32> to vector<1x16x16xf32>
    tpu.vector_store %arg3[%c0_6, %c0_7, %c0_8], %11 {strides = array<i32>} : memref<1x16x16xf32, #tpu.memory_space<vmem>>, vector<1x16x16xf32>,
    %c0_9 = arith.constant 0 : index
    %c0_10 = arith.constant 0 : index
    %c0_11 = arith.constant 0 : index
    %12 = vector.load %arg4[%c0_9, %c0_10, %c0_11] : memref<1x16x1xf32, #tpu.memory_space<vmem>>, vector<1x16x1xf32>
    %13 = vector.shape_cast %12 : vector<1x16x1xf32> to vector<16x1xf32>
    %14 = arith.extf %4 : vector<16x1024xbf16> to vector<16x1024xf32>
    %cst_12 = arith.constant dense<0.000000e+00> : vector<16xf32>
    %15 = vector.multi_reduction <add>, %14, %cst_12 [1] : vector<16x1024xf32> to vector<16xf32>
    %16 = vector.shape_cast %15 : vector<16xf32> to vector<16x1xf32>
    %17 = arith.addf %13, %16 : vector<16x1xf32>
    %c0_13 = arith.constant 0 : index
    %c0_14 = arith.constant 0 : index
    %c0_15 = arith.constant 0 : index
    %18 = vector.load %arg4[%c0_13, %c0_14, %c0_15] : memref<1x16x1xf32, #tpu.memory_space<vmem>>, vector<1x16x1xf32>
    %19 = vector.shape_cast %18 : vector<1x16x1xf32> to vector<16x1xf32>
    %20 = vector.shape_cast %17 : vector<16x1xf32> to vector<1x16x1xf32>
    tpu.vector_store %arg4[%c0_13, %c0_14, %c0_15], %20 {strides = array<i32>} : memref<1x16x1xf32, #tpu.memory_space<vmem>>, vector<1x16x1xf32>,
    return
  }
  func.func @transform_0(%arg0: i32, %arg1: i32) -> (i32, i32, i32) {
    %c0_i32 = arith.constant 0 : i32
    %c0_i32_0 = arith.constant 0 : i32
    return %arg0, %c0_i32, %arg1 : i32, i32, i32
  }
  func.func @transform_1(%arg0: i32, %arg1: i32) -> (i32, i32, i32) {
    %c0_i32 = arith.constant 0 : i32
    %c0_i32_0 = arith.constant 0 : i32
    %c0_i32_1 = arith.constant 0 : i32
    return %arg0, %c0_i32, %c0_i32_0 : i32, i32, i32
  }
  func.func @transform_2(%arg0: i32, %arg1: i32) -> (i32, i32, i32) {
    %c0_i32 = arith.constant 0 : i32
    %c0_i32_0 = arith.constant 0 : i32
    %c0_i32_1 = arith.constant 0 : i32
    return %arg0, %c0_i32, %c0_i32_0 : i32, i32, i32
  }
}

</mosaic_0001>

<bundles_post_ra>
// kernel: cwmi_loss.5
= control target key start
LH: loop header
LB: loop body
LE: loop exit
PB: predicated region body
PF: predicated region fallthrough
CT: control target
= control target key end

     0   :  { %v41_v8 = vlaneseq  ;;  %s134_s1 = inlined_call_operand.vmem [shape: f32[16,128], index: 1, kind: input, shape index: {}]   ;;  %s135_s0 = inlined_call_operand.vmem [shape: f32[16,128], index: 0, kind: input, shape index: {}]   ;;  %s136_s2 = inlined_call_operand.vmem [shape: f32[1,128], index: 2, kind: output, shape index: {0}]   ;;  %s137_s3 = inlined_call_operand.vmem [shape: f32[1,128], index: 3, kind: output, shape index: {1}]  }
   0x1   :  { %v15_v0 = vld [vmem:[%s134_s1] sm:$0xff]  ;;  %v16_v1 = vld [vmem:[%s134_s1 + $0x8] sm:$0xff] }
   0x2   :  { %v17_v2 = vmax.f32 %v15_v0, 1e-07  ;;  %v18_v3 = vmax.f32 %v16_v1, 1e-07  ;;  %v42_v9 = vshrl.u32 %v41_v8, 7  ;;  %v13_v10 = vld [vmem:[%s135_s0] sm:$0xff] }
   0x3   :  { %v14_v11 = vld [vmem:[%s135_s0 + $0x8] sm:$0xff]  ;;  %v27_v16 = vsub.f32 1.0, %v13_v10  ;;  %v49_v20 = vand.u32 127, %v41_v8 }
   0x4   :  { %v19_v4 = vmin.f32 %v17_v2, 0.9999999  ;;  %v20_v5 = vmin.f32 %v18_v3, 0.9999999  ;;  %v43_v12 = vadd.s32 8, %v42_v9  ;;  %v28_v19 = vsub.f32 1.0, %v14_v11 }
   0x5   :  { %v50_v21 = vmul.u32 128, %v42_v9 }
   0x6   :  { %88 = vlog2.f32 %v19_v4  ;;  %v29_v6 = vsub.f32 1.0, %v19_v4  ;;  %v30_v7 = vsub.f32 1.0, %v20_v5  ;;  %v51_v25 = vmul.u32 128, %v43_v12 }
   0x7   :  { %90 = vlog2.f32 %v20_v5  ;;  %v52_v30 = vadd.s32 %v50_v21, %v49_v20 }
   0x8   :  { %92 = vlog2.f32 %v29_v6  ;;  %v53_v32 = vadd.s32 %v51_v25, %v49_v20 }
   0x9   :  { %94 = vlog2.f32 %v30_v7  ;;  %vm54_vm0 = vcmp.lt.s32.totalorder %v52_v30, 2048 }
   0xa   :  { %vm55_vm1 = vcmp.lt.s32.totalorder %v53_v32, 2048 }
  0x10   :  { %v89_v13 = vpop.eup %88 }
  0x11   :  { %v91_v14 = vpop.eup %90  ;;  %v22_v15 = vmul.f32 0.6931472, %v89_v13 }
  0x12   :  { %v93_v17 = vpop.eup %92  ;;  %v24_v18 = vmul.f32 0.6931472, %v91_v14 }
  0x13   :  { %v95_v22 = vpop.eup %94  ;;  %v25_v23 = vmul.f32 %v22_v15, %v13_v10  ;;  %v32_v24 = vmul.f32 0.6931472, %v93_v17 }
  0x14   :  { %v26_v26 = vmul.f32 %v24_v18, %v14_v11  ;;  %v34_v27 = vmul.f32 0.6931472, %v95_v22 }
  0x15   :  { %v35_v28 = vmul.f32 %v32_v24, %v27_v16 }
  0x16   :  { %v36_v29 = vmul.f32 %v34_v27, %v28_v19 }
  0x17   :  { %v37_v31 = vadd.f32 %v35_v28, %v25_v23 }
  0x18   :  { %v38_v33 = vadd.f32 %v36_v29, %v26_v26 }
  0x19   :  { %v39_v34 = vsub.f32 0.0, %v37_v31 }
  0x1a   :  { %v40_v35 = vsub.f32 0.0, %v38_v33 }
  0x1b   :  { %v56_v36 = vmul.f32 %v39_v34, %v13_v10  ;;  %v60_v37 = vmul.f32 %v39_v34, %v27_v16 }
  0x1c   :  { %v57_v38 = vmul.f32 %v40_v35, %v14_v11  ;;  %v61_v39 = vmul.f32 %v40_v35, %v28_v19 }
  0x1d   :  { %v58_v40 = vsel %vm54_vm0, %v56_v36, 0.0  ;;  %v62_v41 = vsel %vm54_vm0, %v60_v37, 0.0 }
  0x1e   :  { %v59_v42 = vsel %vm55_vm1, %v57_v38, 0.0  ;;  %v63_v43 = vsel %vm55_vm1, %v61_v39, 0.0 }
  0x1f   :  { %v64_v44 = vadd.f32 %v59_v42, %v58_v40  ;;  %v72_v45 = vadd.f32 %v63_v43, %v62_v41 }
  0x21   :  { %v65_v46 = vrot.slane %v64_v44, 4  ;;  %v73_v47 = vrot.slane %v72_v45, 4 }
  0x23   :  { %v66_v48 = vadd.f32 %v65_v46, %v64_v44  ;;  %v74_v49 = vadd.f32 %v73_v47, %v72_v45 }
  0x25   :  { %v67_v50 = vrot.slane %v66_v48, 2  ;;  %v75_v51 = vrot.slane %v74_v49, 2 }
  0x27   :  { %v68_v52 = vadd.f32 %v67_v50, %v66_v48  ;;  %v76_v53 = vadd.f32 %v75_v51, %v74_v49 }
  0x29   :  { %v69_v54 = vrot.slane %v68_v52, 1  ;;  %v77_v55 = vrot.slane %v76_v53, 1 }
  0x2b   :  { %v70_v56 = vadd.f32 %v69_v54, %v68_v52  ;;  %v78_v57 = vadd.f32 %v77_v55, %v76_v53 }
  0x2d   :  { %71 = vst [vmem:[%s136_s2] sm:$0x1] %v70_v56  ;;  %79 = vst [vmem:[%s137_s3] sm:$0x1] %v78_v57 }

// kernel: cwmi_loss.8
= control target key start
LH: loop header
LB: loop body
LE: loop exit
PB: predicated region body
PF: predicated region fallthrough
CT: control target
= control target key end

     0   :  { %vm18_vm0 = vcmask 7168   ;;  %v117_v0 = vmov 0.0   ;;  %vm30_vm1 = vcmask 523264   ;;  %vm118_vm2 = vmmov 0   ;;  %s181_s0 = inlined_call_operand.vmem [shape: bf16[1,16,64], index: 0, kind: input, shape index: {}]   ;;  %s182_s2 = inlined_call_operand.vmem [shape: f32[1,16,1], index: 2, kind: output, shape index: {1}]   ;;  %s183_s1 = inlined_call_operand.vmem [shape: f32[1,16,16], index: 1, kind: output, shape index: {0}]  }
   0x1   :  { %107 = vmatprep.subr.bf16.mxu0 %v117_v0  ;;  %v21_v1 = vld [vmem:[%s181_s0] sm:$0xff]   ;;  %109 = vmatprep.mubr.msk.bf16.mxu0 %vm118_vm2, %v117_v0  ;;  %19 = vst.msk [vmem:[%s182_s2] sm:$0xff] %vm18_vm0, %v117_v0  ;;  %20 = vst.msk [vmem:[%s182_s2 + $0x8] sm:$0xff] %vm18_vm0, %v117_v0  ;;  %vm15_vm3 = vcmask 130048  }
   0x2   :  { %v82_v2 = vunpack.c.l.bf16 %v21_v1  ;;  %v83_v3 = vunpack.c.h.bf16 %v21_v1  ;;  %v32_v4 = vsel %vm30_vm1, %v21_v1, 0  ;;  %16 = vst.msk [vmem:[%s183_s1] sm:$0xff] %vm15_vm3, %v117_v0  ;;  %17 = vst.msk [vmem:[%s183_s1 + $0x8] sm:$0xff] %vm15_vm3, %v117_v0 }
   0x3   :  { %108 = vmatpush3.bf16.xpose.msra.mxu0 %v32_v4 }
   0x4   :  { %v84_v5 = vsel %vm30_vm1, %v82_v2, 0.0  ;;  %v87_v6 = vsel %vm30_vm1, %v83_v3, 0.0 }
   0x5   :  { %85 = vadd.xlane.f32.xlu0 %v84_v5 }
   0x8   :  { %v80_v7 = vld [vmem:[%s182_s2] sm:$0xff]  ;;  %v81_v10 = vld [vmem:[%s182_s2 + $0x8] sm:$0xff] }
   0x9   :  { %88 = vadd.xlane.f32.xlu0 %v87_v6  ;;  %v23_v13 = vld [vmem:[%s183_s1] sm:$0xff]  ;;  %v24_v15 = vld [vmem:[%s183_s1 + $0x8] sm:$0xff] }
   0xa   :  { %110 = vmatmul.mubr.msk.bf16.vlgmr.msra.gmra.mrb[0].mxu0 %vm30_vm1, %v21_v1 }
  0x92   :  { %v86_v8 = vpop.xlane.xlu0 %85 }
  0x93   :  { %v90_v9 = vadd.f32 %v86_v8, %v80_v7 }
  0x95   :  { %93 = vst.msk [vmem:[%s182_s2] sm:$0xff] %vm18_vm0, %v90_v9 }
  0x96   :  { %v89_v11 = vpop.xlane.xlu0 %88 }
  0x97   :  { %v91_v12 = vadd.f32 %v89_v11, %v81_v10 }
  0x99   :  { %94 = vst.msk [vmem:[%s182_s2 + $0x8] sm:$0xff] %vm18_vm0, %v91_v12 }
  0xdd   :  { %v68_v14 = vpop.f32.mrb[0].mxu0 }
  0xde   :  { %v75_v16 = vadd.f32 %v68_v14, %v23_v13  ;;  %v111_v17 = vpop.f32.mrb[1].mxu0 }
  0xdf   :  { %v71_v18 = vpop.f32.mrb[2].mxu0 }
  0xe0   :  { %78 = vst.msk [vmem:[%s183_s1] sm:$0xff] %vm15_vm3, %v75_v16  ;;  %v76_v19 = vadd.f32 %v71_v18, %v24_v15  ;;  %v112_v20 = vpop.f32.mrb[3].mxu0 }
  0xe2   :  { %79 = vst.msk [vmem:[%s183_s1 + $0x8] sm:$0xff] %vm15_vm3, %v76_v19 }

// kernel: cwmi_loss.7
= control target key start
LH: loop header
LB: loop body
LE: loop exit
PB: predicated region body
PF: predicated region fallthrough
CT: control target
= control target key end

     0   :  { %vm18_vm0 = vcmask 7168   ;;  %v111_v2 = vmov 0.0   ;;  %vm15_vm1 = vcmask 130048   ;;  %s177_s0 = inlined_call_operand.vmem [shape: bf16[1,16,256], index: 0, kind: input, shape index: {}]   ;;  %s178_s2 = inlined_call_operand.vmem [shape: f32[1,16,1], index: 2, kind: output, shape index: {1}]   ;;  %s179_s1 = inlined_call_operand.vmem [shape: f32[1,16,16], index: 1, kind: output, shape index: {0}]  }
   0x1   :  { %v21_v0 = vld [vmem:[%s177_s0] sm:$0xff]  ;;  %v22_v1 = vld [vmem:[%s177_s0 + $0x8] sm:$0xff]  ;;  %19 = vst.msk [vmem:[%s178_s2] sm:$0xff] %vm18_vm0, %v111_v2  ;;  %20 = vst.msk [vmem:[%s178_s2 + $0x8] sm:$0xff] %vm18_vm0, %v111_v2 }
   0x2   :  { %v107_v3 = vcombine.high %v21_v0, %v22_v1  ;;  %v106_v4 = vcombine.low %v21_v0, %v22_v1  ;;  %v83_v5 = vunpack.c.l.bf16 %v21_v0  ;;  %v84_v6 = vunpack.c.h.bf16 %v21_v0  ;;  %16 = vst.msk [vmem:[%s179_s1] sm:$0xff] %vm15_vm1, %v111_v2  ;;  %17 = vst.msk [vmem:[%s179_s1 + $0x8] sm:$0xff] %vm15_vm1, %v111_v2 }
   0x3   :  { %v85_v7 = vunpack.c.l.bf16 %v22_v1  ;;  %v86_v8 = vunpack.c.h.bf16 %v22_v1 }
   0x4   :  { %35 = vmatprep.subr.bf16.mxu0 %v107_v3  ;;  %67 = vmatprep.mubr.bf16.mxu0 %v107_v3  ;;  %v87_v9 = vadd.f32 %v84_v6, %v83_v5 }
   0x5   :  { %36 = vmatpush1.bf16.xpose.msra.mxu0 %v106_v4  ;;  %v90_v10 = vadd.f32 %v86_v8, %v85_v7 }
   0x6   :  { %88 = vadd.xlane.f32.xlu0 %v87_v9 }
   0x8   :  { %v81_v11 = vld [vmem:[%s178_s2] sm:$0xff]  ;;  %v82_v14 = vld [vmem:[%s178_s2 + $0x8] sm:$0xff] }
   0x9   :  { %v23_v17 = vld [vmem:[%s179_s1] sm:$0xff]  ;;  %v24_v19 = vld [vmem:[%s179_s1 + $0x8] sm:$0xff] }
   0xa   :  { %91 = vadd.xlane.f32.xlu0 %v90_v10 }
   0xc   :  { %68 = vmatmul.mubr.bf16.vlgmr.msra.gmra.mrb[0].mxu0 %v106_v4 }
  0x93   :  { %v89_v12 = vpop.xlane.xlu0 %88 }
  0x94   :  { %v93_v13 = vadd.f32 %v89_v12, %v81_v11 }
  0x96   :  { %96 = vst.msk [vmem:[%s178_s2] sm:$0xff] %vm18_vm0, %v93_v13 }
  0x97   :  { %v92_v15 = vpop.xlane.xlu0 %91 }
  0x98   :  { %v94_v16 = vadd.f32 %v92_v15, %v82_v14 }
  0x9a   :  { %97 = vst.msk [vmem:[%s178_s2 + $0x8] sm:$0xff] %vm18_vm0, %v94_v16 }
  0xdf   :  { %v69_v18 = vpop.f32.mrb[0].mxu0 }
  0xe0   :  { %v76_v20 = vadd.f32 %v69_v18, %v23_v17  ;;  %v71_v21 = vpop.f32.mrb[1].mxu0 }
  0xe1   :  { %v72_v22 = vpop.f32.mrb[2].mxu0 }
  0xe2   :  { %79 = vst.msk [vmem:[%s179_s1] sm:$0xff] %vm15_vm1, %v76_v20  ;;  %v77_v23 = vadd.f32 %v72_v22, %v24_v19  ;;  %v74_v24 = vpop.f32.mrb[3].mxu0 }
  0xe4   :  { %80 = vst.msk [vmem:[%s179_s1 + $0x8] sm:$0xff] %vm15_vm1, %v77_v23 }

// kernel: cwmi_loss.9
= control target key start
LH: loop header
LB: loop body
LE: loop exit
PB: predicated region body
PF: predicated region fallthrough
CT: control target
= control target key end

     0   :  { %vm18_vm0 = vcmask 7168   ;;  %v116_v0 = vmov 0.0   ;;  %vm15_vm1 = vcmask 130048   ;;  %vm117_vm2 = vmmov 0   ;;  %s184_s0 = inlined_call_operand.vmem [shape: bf16[1,16,16], index: 0, kind: input, shape index: {}]   ;;  %s185_s2 = inlined_call_operand.vmem [shape: f32[1,16,1], index: 2, kind: output, shape index: {1}]   ;;  %s186_s1 = inlined_call_operand.vmem [shape: f32[1,16,16], index: 1, kind: output, shape index: {0}]  }
   0x1   :  { %106 = vmatprep.subr.bf16.mxu0 %v116_v0  ;;  %v21_v1 = vld [vmem:[%s184_s0] sm:$0xff]   ;;  %108 = vmatprep.mubr.msk.bf16.mxu0 %vm117_vm2, %v116_v0  ;;  %19 = vst.msk [vmem:[%s185_s2] sm:$0xff] %vm18_vm0, %v116_v0  ;;  %20 = vst.msk [vmem:[%s185_s2 + $0x8] sm:$0xff] %vm18_vm0, %v116_v0 }
   0x2   :  { %v81_v2 = vunpack.c.l.bf16 %v21_v1  ;;  %v82_v3 = vunpack.c.h.bf16 %v21_v1  ;;  %v32_v4 = vsel %vm15_vm1, %v21_v1, 0  ;;  %16 = vst.msk [vmem:[%s186_s1] sm:$0xff] %vm15_vm1, %v116_v0  ;;  %17 = vst.msk [vmem:[%s186_s1 + $0x8] sm:$0xff] %vm15_vm1, %v116_v0 }
   0x3   :  { %107 = vmatpush3.bf16.xpose.msra.mxu0 %v32_v4 }
   0x4   :  { %v83_v5 = vsel %vm15_vm1, %v81_v2, 0.0  ;;  %v86_v6 = vsel %vm15_vm1, %v82_v3, 0.0 }
   0x5   :  { %84 = vadd.xlane.f32.xlu0 %v83_v5 }
   0x8   :  { %v79_v7 = vld [vmem:[%s185_s2] sm:$0xff]  ;;  %v80_v10 = vld [vmem:[%s185_s2 + $0x8] sm:$0xff] }
   0x9   :  { %87 = vadd.xlane.f32.xlu0 %v86_v6  ;;  %v23_v13 = vld [vmem:[%s186_s1] sm:$0xff]  ;;  %v24_v15 = vld [vmem:[%s186_s1 + $0x8] sm:$0xff] }
   0xa   :  { %109 = vmatmul.mubr.msk.bf16.vlgmr.msra.gmra.mrb[0].mxu0 %vm15_vm1, %v21_v1 }
  0x92   :  { %v85_v8 = vpop.xlane.xlu0 %84 }
  0x93   :  { %v89_v9 = vadd.f32 %v85_v8, %v79_v7 }
  0x95   :  { %92 = vst.msk [vmem:[%s185_s2] sm:$0xff] %vm18_vm0, %v89_v9 }
  0x96   :  { %v88_v11 = vpop.xlane.xlu0 %87 }
  0x97   :  { %v90_v12 = vadd.f32 %v88_v11, %v80_v10 }
  0x99   :  { %93 = vst.msk [vmem:[%s185_s2 + $0x8] sm:$0xff] %vm18_vm0, %v90_v12 }
  0xdd   :  { %v68_v14 = vpop.f32.mrb[0].mxu0 }
  0xde   :  { %v75_v16 = vadd.f32 %v68_v14, %v23_v13  ;;  %v110_v17 = vpop.f32.mrb[1].mxu0 }
  0xdf   :  { %v71_v18 = vpop.f32.mrb[2].mxu0 }
  0xe0   :  { %77 = vst.msk [vmem:[%s186_s1] sm:$0xff] %vm15_vm1, %v75_v16  ;;  %v76_v19 = vadd.f32 %v71_v18, %v24_v15  ;;  %v111_v20 = vpop.f32.mrb[3].mxu0 }
  0xe2   :  { %78 = vst.msk [vmem:[%s186_s1 + $0x8] sm:$0xff] %vm15_vm1, %v76_v19 }

// kernel: custom-call.48
= control target key start
LH: loop header
LB: loop body
LE: loop exit
PB: predicated region body
PF: predicated region fallthrough
CT: control target
= control target key end

     0   :  { %5 = vsyncpa [#allocation6], 0  ;;  %s896_s0 = inlined_call_operand.vmem [shape: f32[2,4,4], index: 0, kind: input, shape index: {}]   ;;  %s897_s1 = inlined_call_operand.vmem [shape: f32[2,4,4], index: 1, kind: output, shape index: {0}]   ;;  %s898_s2 = inlined_call_operand.hbm [shape: s32[2,4], index: 2, kind: output, shape index: {1}]   ;;  %s899_s3 = inlined_call_operand.vmem [shape: s32[2,4], index: 3, kind: output, shape index: {2}]  }
   0x1   :  { %7 = vsyncpa [#allocation6 + $0x1], 0  ;;  %s715_s12 = smov 0   ;;  %s717_s13 = smov 0  }
   0x2   :  { %s719_s14 = smov 0   ;;  %s721_s15 = smov 0  }
   0x3 LB: > { %s736_s16 = sadd.s32 4294967295, %s687_s15   ;;  %s550_s17 = sadd.s32 4294967294, %s687_s15   ;;  %s687_s15 = sphi %s721_s15, %s907_s15   ;;  %s683_s14 = sphi %s719_s14, %s906_s14   ;;  %s679_s13 = sphi %s717_s13, %s905_s13   ;;  %s675_s12 = sphi %s715_s12, %s904_s12  }
   0x4   : > { %s740_s18 = sadd.s32 1, %s687_s15   ;;  %s17_s19 = sshrl.u32 %s687_s15, 3 }
   0x5   : > { %s18_s20 = sshrl.u32 %s740_s18, 3  ;;  %s22_s21 = sadd.s32 1, %s683_s14 }
   0x6   : > { %s19_s22 = ssub.s32 %s17_s19, %s18_s20  ;;  %p32_p0 = scmp.ne.s32.totalorder %s683_s14, %s679_s13 }
   0x7   : > { %p20_p1 = scmp.eq.s32.totalorder %s19_s22, 0  ;;  %p33_p2 = scmp.eq.s32.totalorder %s736_s16, 1 }
   0x8   : > { %p38_p3 = scmp.ne.s32.totalorder %s679_s13, %s675_s12  ;;  %p39_p4 = scmp.eq.s32.totalorder %s550_s17, 1 }
   0x9   : > { %s751_s23 = scalar_select %p20_p1, %s683_s14, %s22_s21  }
   0xa   : > { %p753_p5 = por %p33_p2, %p32_p0  ;;  %p757_p6 = por %p39_p4, %p38_p3 }
   0xb   : > { %p552_p7 = scmp.ge.s32.totalorder %s687_s15, 2 }
   0xc   : > { %s85_s26 = sand.u32 (!%p552_p7), 1, %s687_s15   ;;  %s554_s27 = sshll.u32 (!%p552_p7), %s687_s15, 2 }
   0xd   : > { %83 = sbr.rel (%p552_p7) target bundleno = 20 (0x14), region = 16  ;;  %s553_s28 = sshll.u32 (!%p552_p7), %s85_s26, 2 }
   0xe   : > { %s89_s4 = scalar_lea.vmem (!%p552_p7), %s896_s0, %s554_s27  ;;  %s87_s5 = scalar_lea.vmem (!%p552_p7), [#allocation1], %s553_s28 }
   0xf   : > { %v105_v0 = vld [vmem:[%s89_s4] sm:$0xf] (!%p552_p7) }
  0x10   : > { %106 = vst [vmem:[%s87_s5] sm:$0xf] (!%p552_p7), %v105_v0 }
  0x14 PF: > { %p555_p8 = scmp.ge.s32.totalorder %s687_s15, 1  ;;  %p122_p9 = scmp.lt.s32.totalorder %s687_s15, 3 }
  0x16   : > { %p123_p10 = pnand %p555_p8, %p122_p9 }
  0x18   : > { %126 = sbr.rel (%p123_p10) target bundleno = 451 (0x1c3), region = 50 }
  0x1f   : > { %s133_s6 = sand.u32 1, %s736_s16   ;;  %s144_s7 = sand.u32 1, %s679_s13   ;;  %v166_v1 = vlaneseq  ;;  %v693_v4 = vmov 0  }
  0x20   : > { %s773_s8 = sshll.u32 %s133_s6, 2  ;;  %s777_s9 = sshll.u32 %s144_s7, 1 }
  0x21   : > { %v780_v2 = vshrl.u32 %v166_v1, 7  ;;  %s135_s10 = scalar_lea.vmem [#allocation1], %s773_s8  ;;  %s161_s11 = sand.u32 7, %s736_s16  }
  0x22   : > { %v155_v3 = vld [vmem:[%s135_s10] sm:$0xf]  ;;  %s785_s17 = scalar_lea.vmem [#allocation4], %s161_s11  ;;  %s139_s19 = scalar_lea.vmem [#allocation3], %s773_s8 }
  0x23   : > { %156 = vst [vmem:[#allocation0] sm:$0xf] %v155_v3  ;;  %170 = vst [vmem:[#allocation9] sm:$0xff] %v780_v2  ;;  %s146_s20 = scalar_lea.vmem [#allocation5], %s777_s9  ;;  %s152_s21 = scalar_lea.vmem [#allocation8], %s777_s9 }
  0x24   : > { %165 = vst [vmem:[%s785_s17] sm:$0x1] %v693_v4  ;;  %s791_s22 = scalar_lea.vmem [#allocation7], %s161_s11  ;;  %s793_s26 = smov 0  }
  0x2a   : > { %v159_v5 = vld [vmem:[#allocation0] sm:$0xff] }
  0x2b   : > { %160 = vst [vmem:[#allocation2] sm:$0xff] %v159_v5 }
  0x2c LB: >> { %vm186_vm0 = vcmp.lt.s32.totalorder %v780_v2, 4  ;;  %v800_v8 = vstv %s691_s26  ;;  %s227_s27 = ssub.s32 128, %s691_s26  ;;  %v233_v38 = vand.u32 127, %v166_v1  ;;  %v236_v40 = vld [vmem:[%s785_s17] ss:$0 sm:$0xff]  ;;  %s239_s28 = scalar_lea.vmem [#allocation2], %s691_s26  ;;  %s691_s26 = sphi %s793_s26, %s176_s26  }
  0x2d   : >> { %vm185_vm1 = vcmp.ge.s32.totalorder %v780_v2, %v800_v8  ;;  %s245_s30 = scalar_lea.vmem [#allocation9], %s691_s26  ;;  %vm265_vm15 = vcmp.gt.s32.totalorder %v780_v2, %v800_v8  ;;  %s176_s26 = sadd.s32 1, %s691_s26  }
  0x2e   : >> { %vm187_vm3 = vmand %vm185_vm1, %vm186_vm0  ;;  %vm257_vm12 = vcmp.gt.s32.totalorder %v233_v38, %v800_v8  ;;  %vm234_vm13 = vcmp.eq.s32.totalorder %v233_v38, %v800_v8  ;;  %v247_v42 = vld [vmem:[%s245_s30] ss:$0 sm:$0xff]  ;;  %p173_p11 = scmp.ge.s32.totalorder %s176_s26, 4  }
  0x2f   : >> { %vm269_vm1 = vmand %vm265_vm15, %vm234_vm13  ;;  %s900_s6 = sshrl.u32 (%p173_p11), %s736_s16, 3  ;;  %s564_s10 = sshll.u32 (%p173_p11), %s736_s16, 2 }
  0x30   : > { %s565_s11 = sshll.u32 (%p173_p11), %s900_s6, 5 }
  0x32   : >> { %v181_v6 = vld [vmem:[#allocation2] sm:$0xff]  ;;  %v241_v41 = vld [vmem:[%s239_s28] ss:$0 sm:$0xff] }
  0x33   : >> { %v182_v7 = vand.u32 2147483647, %v181_v6 }
  0x35   : >> { %vm560_vm2 = vcmp.gt.f32.partialorder %v182_v7, -inf }
  0x36   : >> { %vm189_vm4 = vmand %vm187_vm3, %vm560_vm2 }
  0x37   : >> { %v190_v9 = vsel %vm189_vm4, %v780_v2, %v800_v8  ;;  %v191_v10 = vsel %vm189_vm4, %v182_v7, -inf }
  0x38   : >> { %v192_v11 = vrot.slane %v191_v10, 1  ;;  %v193_v12 = vrot.slane %v190_v9, 1 }
  0x3a   : >> { %vm194_vm5 = vcmp.ge.f32.partialorder %v192_v11, %v191_v10  ;;  %v197_v13 = vrot.slane %v192_v11, 1  ;;  %v198_v14 = vrot.slane %v193_v12, 1 }
  0x3b   : >> { %v195_v15 = vsel %vm194_vm5, %v192_v11, %v191_v10  ;;  %v196_v16 = vsel %vm194_vm5, %v193_v12, %v190_v9 }
  0x3c   : >> { %vm199_vm6 = vcmp.ge.f32.partialorder %v197_v13, %v195_v15  ;;  %v202_v17 = vrot.slane %v197_v13, 1  ;;  %v203_v18 = vrot.slane %v198_v14, 1 }
  0x3d   : >> { %v200_v19 = vsel %vm199_vm6, %v197_v13, %v195_v15  ;;  %v201_v20 = vsel %vm199_vm6, %v198_v14, %v196_v16 }
  0x3e   : >> { %vm204_vm7 = vcmp.ge.f32.partialorder %v202_v17, %v200_v19  ;;  %v207_v21 = vrot.slane %v202_v17, 1  ;;  %v208_v22 = vrot.slane %v203_v18, 1 }
  0x3f   : >> { %v205_v23 = vsel %vm204_vm7, %v202_v17, %v200_v19  ;;  %v206_v24 = vsel %vm204_vm7, %v203_v18, %v201_v20 }
  0x40   : >> { %vm209_vm8 = vcmp.ge.f32.partialorder %v207_v21, %v205_v23  ;;  %v212_v25 = vrot.slane %v207_v21, 1  ;;  %v213_v26 = vrot.slane %v208_v22, 1 }
  0x41   : >> { %v210_v27 = vsel %vm209_vm8, %v207_v21, %v205_v23  ;;  %v211_v28 = vsel %vm209_vm8, %v208_v22, %v206_v24 }
  0x42   : >> { %vm214_vm9 = vcmp.ge.f32.partialorder %v212_v25, %v210_v27  ;;  %v217_v29 = vrot.slane %v212_v25, 1  ;;  %v218_v30 = vrot.slane %v213_v26, 1 }
  0x43   : >> { %v215_v31 = vsel %vm214_vm9, %v212_v25, %v210_v27  ;;  %v216_v32 = vsel %vm214_vm9, %v213_v26, %v211_v28 }
  0x44   : >> { %vm219_vm10 = vcmp.ge.f32.partialorder %v217_v29, %v215_v31  ;;  %v222_v33 = vrot.slane %v217_v29, 1  ;;  %v223_v34 = vrot.slane %v218_v30, 1 }
  0x45   : >> { %v220_v35 = vsel %vm219_vm10, %v217_v29, %v215_v31  ;;  %v221_v36 = vsel %vm219_vm10, %v218_v30, %v216_v32 }
  0x46   : >> { %vm224_vm11 = vcmp.ge.f32.partialorder %v222_v33, %v220_v35 }
  0x47   : >> { %v226_v37 = vsel %vm224_vm11, %v223_v34, %v221_v36 }
  0x48   : >> { %228 = vrot.lane.b32.xlu0 %v226_v37, %s227_s27  ;;  %s357_s27 = scalar_lea.vmem (%p173_p11), %s897_s1, %s564_s10 }
  0xba   : >> { %v229_v39 = vpop.permute.xlu0 %228 }
  0xbb   : >> { %569 = vpush %v229_v39 }
  0xec   : >> { %s570_s29 = spop %569 }
  0xed   : >> { %v235_v43 = vstv %s570_s29  ;;  %s240_s4 = scalar_lea.vmem [#allocation2], %s570_s29  ;;  %s246_s5 = scalar_lea.vmem [#allocation9], %s570_s29 }
  0xee   : >> { %v242_v44 = vld [vmem:[%s240_s4] ss:$0 sm:$0xff]  ;;  %v237_v46 = vsel %vm234_vm13, %v235_v43, %v236_v40 }
  0xef   : >> { %v248_v45 = vld [vmem:[%s246_s5] ss:$0 sm:$0xff]  ;;  %243 = vst [vmem:[%s240_s4] sm:$0x1] %v241_v41  ;;  %vm251_vm14 = vcmp.ne.f32.partialorder %v242_v44, 0.0  ;;  %238 = vst [vmem:[%s785_s17] sm:$0x1] %v237_v46  ;;  %v258_v53 = vsel %vm257_vm12, %v242_v44, 0.0 }
  0xf0   : >> { %249 = vst [vmem:[%s246_s5] sm:$0x1] %v247_v42  ;;  %244 = vst [vmem:[%s239_s28] sm:$0x1] %v242_v44  ;;  %s399_s4 = sshll.u32 (%p173_p11), %s146_s20, 4  ;;  %s348_s5 = scalar_lea.sflag (%p173_p11), [#allocation6], %s144_s7  ;;  %s400_s4 = int_to_ptr.vmem [resolvable:$true] %s399_s4 }
  0xf1   : >> { %250 = vst [vmem:[%s245_s30] sm:$0x1] %v248_v45  ;;  %vm252_vm0 = vmand %vm234_vm13, %vm251_vm14  ;;  %s843_s30 = scalar_lea.hbm (%p173_p11), %s898_s2, %s565_s11  ;;  %s621_s6 = scalar_lea.vmem (%p173_p11), %s400_s4, 32 }
  0xf2   : >> { %v253_v47 = vsel %vm252_vm0, %v242_v44, 1.0  ;;  %p622_p12 = scmp.ne.s32.totalorder (%p173_p11), %s400_s4, %s621_s6  ;;  %s694_s17 = smov (%p173_p11), [#allocation5]  }
  0xf3   : >> { %v266_v48 = vsel %vm265_vm15, %v253_v47, 1.0  ;;  %s625_s10 = sshll.u32 (%p173_p11), %s694_s17, 4  ;;  %s626_s10 = int_to_ptr.vmem [resolvable:$false] %s625_s10 }
  0xf4   : >> { %619 = vrcp.f32 %v266_v48  ;;  %p623_p13 = pnand (%p173_p11), %p622_p12, %p753_p5  ;;  %s627_s8 = scalar_lea.vmem (%p173_p11), %s626_s10, 64 }
  0xf5   : > { %p628_p1 = scmp.lt.s32.totalorder (%p173_p11), %s400_s4, %s626_s10  ;;  %p629_p2 = scmp.lt.s32.totalorder (%p173_p11), %s627_s8, %s621_s6 }
  0xf6   : > { %v334_v59 = vld [vmem:[#allocation4] sm:$0x3] (%p173_p11)  ;;  %p624_p0 = pneg (%p173_p11), %p623_p13 }
  0xf7   : >> { %v262_v50 = vld [vmem:[#allocation2] sm:$0xff]  ;;  %336 = vst [vmem:[%s146_s20] sm:$0x3] (%p173_p11), %v334_v59  ;;  %p630_p3 = por (%p173_p11), %p629_p2, %p628_p1 }
  0xf8   : > { %v276_v57 = vld [vmem:[#allocation9] sm:$0xff] (%p173_p11) }
  0xf9   : > { %p631_p4 = pnand (%p173_p11), %p630_p3, %p624_p0 }
  0xfe   : >> { %v620_v49 = vpop.eup %619 }
  0xff   : >> { %v268_v51 = vmul.f32 %v620_v49, %v262_v50 }
 0x101   : >> { %v270_v52 = vsel %vm269_vm1, %v268_v51, 0.0 }
 0x102   : >> { %271 = vadd.xlane.f32.xlu0 %v270_v52 }
 0x12f   : > { %292 = vxpose.xlu0.b32.start.end [1/1] (short) (narrow) (%p173_p11), %v276_v57, 8 }
 0x18e   : > { %175 = sbr.rel (!%p173_p11) target bundleno = 44 (0x2c), region = 202 }
 0x18f   : >> { %v272_v54 = vpop.xlane.xlu0 %271 }
 0x190   : >> { %v273_v55 = vmul.f32 %v272_v54, %v258_v53 }
 0x192   : >> { %v274_v56 = vsub.f32 %v268_v51, %v273_v55 }
 0x194   : >> { %275 = vst [vmem:[#allocation2] sm:$0xff] %v274_v56 }
 0x19b   : > { %v328_v58 = vld [vmem:[#allocation2] sm:$0xf] }
 0x19c   : > { %330 = vst [vmem:[%s139_s19] sm:$0xf] %v328_v58 }
 0x1a3   : > { %v373_v60 = vld [vmem:[%s139_s19] sm:$0xf] }
 0x1a4   : > { %374 = vst [vmem:[%s357_s27] sm:$0xf] %v373_v60 }
 0x1a5   : > { %634 = shalt.err (!%p631_p4)
}
 0x1a6   : > { %s635_s7 = scalar_lea.hbm %s843_s30, 32  ;;  %s639_s11 = scalar_lea.hbm %s898_s2, 32 }
 0x1a7   : > { %p636_p8 = scmp.ne.s32.totalorder %s843_s30, %s635_s7  ;;  %p640_p11 = scmp.lt.u32.totalorder %s843_s30, %s898_s2 }
 0x1a8   : > { %p641_p12 = scmp.lt.u32.totalorder %s639_s11, %s635_s7  ;;  %p643_p0 = scmp.lt.u32.totalorder %s635_s7, %s843_s30 }
 0x1a9   : > { %p637_p9 = pnand %p636_p8, %p753_p5 }
 0x1aa   : > { %p642_p13 = por %p641_p12, %p640_p11 }
 0x1ab   : > { %p638_p10 = pneg %p637_p9 }
 0x1ac   : > { %p644_p1 = por %p643_p0, %p642_p13 }
 0x1ae   : > { %p645_p2 = pnand %p644_p1, %p638_p10 }
 0x1b0   : > { %648 = shalt.err (!%p645_p2)
}
 0x1b1   : > { %571 = dma.vmem_to_hbm [thread:$0]  (%p753_p5), %s400_s4, 32, %s843_s30, %s348_s5   ;;  %v308_v61 = vpop.trf.xlu0 }
 0x1b2   : > { %324 = vst [vmem:[%s791_s22] sm:$0x1] %v308_v61  ;;  %s903_s6 = sshrl.u32 (%p753_p5), %s736_s16, 3 }
 0x1b3   : > { %s566_s28 = sshll.u32 (%p753_p5), %s903_s6, 1 }
 0x1b4   : > { %405 = sbr.rel (!%p753_p5) target bundleno = 451 (0x1c3), region = 96  ;;  %s408_s10 = scalar_lea.vmem (%p753_p5), %s899_s3, %s566_s28 }
 0x1b9   : > { %v340_v62 = vld [vmem:[#allocation7] sm:$0x3] }
 0x1ba   : > { %342 = vst [vmem:[%s152_s21] sm:$0x3] %v340_v62 }
 0x1c1   : > { %v424_v63 = vld [vmem:[%s152_s21] sm:$0x3] }
 0x1c2   : > { %425 = vst [vmem:[%s408_s10] sm:$0x3] %v424_v63 }
 0x1c3 PF: > { %s452_s22 = sand.u32 1, %s675_s12   ;;  %p574_p5 = pnand %p552_p7, %p757_p6 }
 0x1c4   : > { %s453_s24 = scalar_lea.sflag [#allocation6], %s452_s22 }
 0x1c5   : > { %670 = dma.done.wait (!%p574_p5), %s453_s24, 32  }
 0x1c6   : > { %672 = vsyncadd (!%p574_p5), %s453_s24, 4294967264  ;;  %p10_p3 = scmp.ge.s32.totalorder %s740_s18, 4   ;;  %s904_s12 = smov %s679_s13 }
 0x1c7   : > { %s905_s13 = smov %s683_s14  ;;  %s906_s14 = smov %s751_s23 }
 0x1c8   : > { %s907_s15 = smov %s740_s18  ;;  %12 = sbr.rel (!%p10_p3) target bundleno = 3 (0x3), region = 213 }
 0x1cf   :  { %465 = vsyncpa [#allocation6], 1 }
 0x1d0   :  { %467 = vsyncpa [#allocation6 + $0x1], 1 }

// kernel: custom-call.68
= control target key start
LH: loop header
LB: loop body
LE: loop exit
PB: predicated region body
PF: predicated region fallthrough
CT: control target
= control target key end

     0   :  { %s353_s6 = smov 0   ;;  %s355_s7 = smov 0   ;;  %s400_s0 = inlined_call_operand.vmem [shape: f32[2,1,4,4], index: 0, kind: input, shape index: {}]   ;;  %s401_s1 = inlined_call_operand.vmem [shape: f32[2,1,4,4], index: 1, kind: output, shape index: {}]  }
   0x1   :  { %s357_s8 = smov 0  }
   0x2 LB: > { %s279_s9 = sadd.s32 4294967295, %s340_s8   ;;  %s33_s10 = sadd.s32 1, %s336_s7  ;;  %s340_s8 = sphi %s357_s8, %s7_s8   ;;  %s336_s7 = sphi %s355_s7, %s403_s7   ;;  %s332_s6 = sphi %s353_s6, %s402_s6  }
   0x3   : > { %p35_p0 = scmp.ge.s32.totalorder %s33_s10, 2  ;;  %p281_p1 = scmp.ge.s32.totalorder %s340_s8, 2 }
   0x4   : > { %s49_s11 = sand.u32 (!%p281_p1), 1, %s340_s8   ;;  %s283_s12 = sshll.u32 (!%p281_p1), %s336_s7, 2 }
   0x5   : > { %s405_s10 = smov (%p35_p0, %s33_s10), 0  ;;  %47 = sbr.rel (%p281_p1) target bundleno = 12 (0xc), region = 16 }
   0x6   : > { %s282_s13 = sshll.u32 (!%p281_p1), %s49_s11, 2  ;;  %s56_s16 = scalar_lea.vmem (!%p281_p1), %s400_s0, %s283_s12 }
   0x7   : > { %v72_v0 = vld [vmem:[%s56_s16] sm:$0xf] (!%p281_p1)  ;;  %s51_s17 = scalar_lea.vmem (!%p281_p1), [#allocation1], %s282_s13 }
   0x8   : > { %73 = vst [vmem:[%s51_s17] sm:$0xf] (!%p281_p1), %v72_v0 }
   0xc PF: > { %p284_p2 = scmp.ge.s32.totalorder %s340_s8, 1  ;;  %p89_p3 = scmp.lt.s32.totalorder %s340_s8, 3 }
   0xe   : > { %p90_p4 = pnand %p284_p2, %p89_p3 }
  0x10   : > { %93 = sbr.rel (%p90_p4) target bundleno = 656 (0x290), region = 50 }
  0x17   : > { %s380_s18 = sand.u32 1, %s279_s9   ;;  %v111_v1 = vlaneseq  ;;  %v342_v11 = vmov -1.0   ;;  %s288_s22 = sshll.u32 %s332_s6, 2 }
  0x18   : > { %s285_s19 = sshll.u32 %s380_s18, 2  ;;  %s188_s25 = scalar_lea.vmem %s401_s1, %s288_s22 }
  0x19   : > { %s102_s20 = scalar_lea.vmem [#allocation1], %s285_s19  ;;  %v112_v3 = vand.u32 127, %v111_v1  ;;  %v115_v4 = vshrl.u32 %v111_v1, 7  ;;  %s106_s21 = scalar_lea.vmem [#allocation3], %s285_s19 }
  0x1a   : > { %v109_v2 = vld [vmem:[%s102_s20] sm:$0xf] }
  0x1b   : > { %110 = vst [vmem:[#allocation0] sm:$0xf] %v109_v2  ;;  %vm113_vm0 = vcmp.lt.s32.totalorder %v112_v3, 4  ;;  %vm122_vm1 = vcmp.ge.s32.totalorder %v115_v4, %v112_v3  ;;  %vm117_vm2 = vcmp.eq.s32.totalorder %v115_v4, %v112_v3  ;;  %vm136_vm4 = vcmp.eq.s32.totalorder %v112_v3, 0 }
  0x1c   : > { %vm123_vm3 = vmand %vm122_vm1, %vm113_vm0  ;;  %vm133_vm5 = vcmp.eq.s32.totalorder %v112_v3, %v115_v4  ;;  %v137_v12 = vsel %vm136_vm4, 1.0, %v342_v11  ;;  %vm144_vm6 = vcmp.eq.s32.totalorder %v112_v3, 1  ;;  %vm154_vm7 = vcmp.eq.s32.totalorder %v112_v3, 2 }
  0x1d   : > { %v138_v13 = vsel %vm133_vm5, %v137_v12, 0.0  ;;  %vm164_vm8 = vcmp.eq.s32.totalorder %v112_v3, 3 }
  0x22   : > { %v118_v5 = vld [vmem:[#allocation0] sm:$0xff] }
  0x23   : > { %v119_v6 = vsel %vm117_vm2, %v118_v5, 0.0  ;;  %v124_v7 = vsel %vm123_vm3, %v118_v5, 0.0 }
  0x24   : > { %120 = vadd.xlane.f32.xlu0 %v119_v6 }
  0xb1   : > { %v121_v8 = vpop.xlane.xlu0 %120 }
  0xb2   : > { %316 = vrcp.f32 %v121_v8  ;;  %vm171_vm9 = vweird.f32 %v121_v8 }
  0xbc   : > { %v317_v9 = vpop.eup %316 }
  0xbd   : > { %v126_v10 = vmul.f32 %v317_v9, %v124_v7 }
  0xbf   : > { %127 = vst [vmem:[#allocation4] sm:$0xff] %v126_v10 }
  0xc6   : > { %v140_v14 = vld [vmem:[#allocation4 + $0x1] ss:$0 sm:$0xff]  ;;  %v150_v17 = vld [vmem:[#allocation4 + $0x2] ss:$0 sm:$0xff]  ;;  %v160_v22 = vld [vmem:[#allocation4 + $0x3] ss:$0 sm:$0xff] }
  0xc7   : > { %v141_v15 = vxor.u32 2147483648, %v140_v14  ;;  %v151_v19 = vxor.u32 2147483648, %v150_v17  ;;  %v161_v24 = vxor.u32 2147483648, %v160_v22 }
  0xc9   : > { %v145_v16 = vmul.f32 %v141_v15, %v138_v13 }
  0xcb   : > { %146 = vadd.xlane.f32.xlu0 %v145_v16 }
 0x158   : > { %v147_v18 = vpop.xlane.xlu0 %146 }
 0x159   : > { %v148_v20 = vsel %vm144_vm6, %v147_v18, %v138_v13 }
 0x15a   : > { %v155_v21 = vmul.f32 %v151_v19, %v148_v20 }
 0x15c   : > { %156 = vadd.xlane.f32.xlu1 %v155_v21 }
 0x1e9   : > { %v157_v23 = vpop.xlane.xlu1 %156 }
 0x1ea   : > { %v158_v25 = vsel %vm154_vm7, %v157_v23, %v148_v20 }
 0x1eb   : > { %v165_v26 = vmul.f32 %v161_v24, %v158_v25 }
 0x1ed   : > { %166 = vadd.xlane.f32.xlu1 %v165_v26 }
 0x27a   : > { %v167_v27 = vpop.xlane.xlu1 %166 }
 0x27b   : > { %v168_v28 = vsel %vm164_vm8, %v167_v27, %v158_v25 }
 0x27c   : > { %v170_v29 = vmul.f32 %v317_v9, %v168_v28 }
 0x27e   : > { %v172_v30 = vsel %vm171_vm9, %v168_v28, %v170_v29 }
 0x27f   : > { %173 = vst [vmem:[#allocation2] sm:$0xff] %v172_v30 }
 0x286   : > { %v177_v31 = vld [vmem:[#allocation2] sm:$0xf] }
 0x287   : > { %179 = vst [vmem:[%s106_s21] sm:$0xf] %v177_v31 }
 0x28e   : > { %v204_v32 = vld [vmem:[%s106_s21] sm:$0xf] }
 0x28f   : > { %205 = vst [vmem:[%s188_s25] sm:$0xf] %v204_v32 }
 0x290 PF: > { %s7_s8 = sadd.s32 1, %s340_s8   ;;  %s402_s6 = smov %s336_s7 }
 0x291   : > { %p4_p5 = scmp.ge.s32.totalorder %s7_s8, 4   ;;  %s403_s7 = smov %s405_s10 }
 0x293   :  { %6 = sbr.rel (!%p4_p5) target bundleno = 2 (0x2), region = 113 }

// kernel: cwmi_loss.6
= control target key start
LH: loop header
LB: loop body
LE: loop exit
PB: predicated region body
PF: predicated region fallthrough
CT: control target
= control target key end

     0   :  { %vm18_vm0 = vcmask 7168   ;;  %v298_v46 = vmov 0.0   ;;  %vm15_vm1 = vcmask 130048   ;;  %s378_s0 = inlined_call_operand.vmem [shape: bf16[1,16,1024], index: 0, kind: input, shape index: {}]   ;;  %s379_s2 = inlined_call_operand.vmem [shape: f32[1,16,1], index: 2, kind: output, shape index: {1}]   ;;  %s380_s1 = inlined_call_operand.vmem [shape: f32[1,16,16], index: 1, kind: output, shape index: {0}]  }
   0x1   :  { %v21_v0 = vld [vmem:[%s378_s0] sm:$0xff]  ;;  %v22_v2 = vld [vmem:[%s378_s0 + $0x8] sm:$0xff]  ;;  %v23_v8 = vld [vmem:[%s378_s0 + $0x10] sm:$0xff]  ;;  %19 = vst.msk [vmem:[%s379_s2] sm:$0xff] %vm18_vm0, %v298_v46 }
   0x2   :  { %v25_v1 = vld [vmem:[%s378_s0 + $0x20] sm:$0xff]  ;;  %v242_v4 = vunpack.c.l.bf16 %v21_v0  ;;  %v243_v5 = vunpack.c.h.bf16 %v21_v0  ;;  %v26_v7 = vld [vmem:[%s378_s0 + $0x28] sm:$0xff]  ;;  %v27_v9 = vld [vmem:[%s378_s0 + $0x30] sm:$0xff]  ;;  %v244_v12 = vunpack.c.l.bf16 %v22_v2  ;;  %v245_v19 = vunpack.c.h.bf16 %v22_v2  ;;  %20 = vst.msk [vmem:[%s379_s2 + $0x8] sm:$0xff] %vm18_vm0, %v298_v46 }
   0x3   :  { %v290_v3 = vcombine.high %v21_v0, %v25_v1  ;;  %v250_v6 = vunpack.c.l.bf16 %v25_v1  ;;  %v251_v10 = vunpack.c.h.bf16 %v25_v1  ;;  %v292_v11 = vcombine.high %v22_v2, %v26_v7  ;;  %v24_v13 = vld [vmem:[%s378_s0 + $0x18] sm:$0xff]  ;;  %16 = vst.msk [vmem:[%s380_s1] sm:$0xff] %vm15_vm1, %v298_v46  ;;  %17 = vst.msk [vmem:[%s380_s1 + $0x8] sm:$0xff] %vm15_vm1, %v298_v46 }
   0x4   :  { %v28_v14 = vld [vmem:[%s378_s0 + $0x38] sm:$0xff]  ;;  %v258_v15 = vadd.f32 %v243_v5, %v242_v4  ;;  %v252_v16 = vunpack.c.l.bf16 %v26_v7  ;;  %v289_v17 = vcombine.low %v21_v0, %v25_v1  ;;  %v291_v20 = vcombine.low %v22_v2, %v26_v7 }
   0x5   :  { %71 = vmatprep.subr.bf16.mxu0 %v290_v3  ;;  %103 = vmatprep.mubr.bf16.mxu0 %v290_v3  ;;  %v267_v18 = vadd.f32 %v251_v10, %v250_v6  ;;  %v294_v21 = vcombine.high %v23_v8, %v27_v9  ;;  %v253_v22 = vunpack.c.h.bf16 %v26_v7  ;;  %v296_v23 = vcombine.high %v24_v13, %v28_v14 }
   0x6   :  { %112 = vmatprep.subr.bf16.mxu1 %v292_v11  ;;  %144 = vmatprep.mubr.bf16.mxu1 %v292_v11  ;;  %v246_v24 = vunpack.c.l.bf16 %v23_v8  ;;  %v259_v25 = vadd.f32 %v258_v15, %v244_v12  ;;  %v254_v26 = vunpack.c.l.bf16 %v27_v9  ;;  %v247_v28 = vunpack.c.h.bf16 %v23_v8 }
   0x7   :  { %72 = vmatpush1.bf16.xpose.msra.mxu0 %v289_v17  ;;  %113 = vmatpush1.bf16.xpose.msra.mxu1 %v291_v20  ;;  %v268_v27 = vadd.f32 %v267_v18, %v252_v16  ;;  %v293_v30 = vcombine.low %v23_v8, %v27_v9  ;;  %v255_v31 = vunpack.c.h.bf16 %v27_v9  ;;  %v295_v33 = vcombine.low %v24_v13, %v28_v14 }
   0x8   :  { %153 = vmatprep.subr.bf16.mxu0 %v294_v21  ;;  %194 = vmatprep.subr.bf16.mxu1 %v296_v23  ;;  %v260_v29 = vadd.f32 %v259_v25, %v245_v19  ;;  %v248_v34 = vunpack.c.l.bf16 %v24_v13  ;;  %v256_v36 = vunpack.c.l.bf16 %v28_v14  ;;  %v249_v38 = vunpack.c.h.bf16 %v24_v13  ;;  %v240_v47 = vld [vmem:[%s379_s2] sm:$0xff] }
   0x9   :  { %v269_v32 = vadd.f32 %v268_v27, %v253_v22  ;;  %v257_v42 = vunpack.c.h.bf16 %v28_v14  ;;  %v241_v50 = vld [vmem:[%s379_s2 + $0x8] sm:$0xff] }
   0xa   :  { %v261_v35 = vadd.f32 %v260_v29, %v246_v24  ;;  %v29_v3 = vld [vmem:[%s380_s1] sm:$0xff]  ;;  %v30_v10 = vld [vmem:[%s380_s1 + $0x8] sm:$0xff] }
   0xb   :  { %v270_v37 = vadd.f32 %v269_v32, %v254_v26 }
   0xc   :  { %v262_v39 = vadd.f32 %v261_v35, %v247_v28 }
   0xd   :  { %v271_v40 = vadd.f32 %v270_v37, %v255_v31 }
   0xe   :  { %104 = vmatmul.mubr.bf16.vlgmr.msra.gmra.mrb[0].mxu0 %v289_v17  ;;  %145 = vmatmul.mubr.bf16.vlgmr.msra.gmra.mrb[0].mxu1 %v291_v20  ;;  %v263_v41 = vadd.f32 %v262_v39, %v248_v34 }
   0xf   :  { %154 = vmatpush1.bf16.xpose.msra.mxu0 %v293_v30  ;;  %195 = vmatpush1.bf16.xpose.msra.mxu1 %v295_v33  ;;  %v272_v43 = vadd.f32 %v271_v40, %v256_v36 }
  0x10   :  { %185 = vmatprep.mubr.bf16.mxu0 %v294_v21  ;;  %226 = vmatprep.mubr.bf16.mxu1 %v296_v23  ;;  %v264_v44 = vadd.f32 %v263_v41, %v249_v38 }
  0x11   :  { %v273_v45 = vadd.f32 %v272_v43, %v257_v42 }
  0x12   :  { %265 = vadd.xlane.f32.xlu0 %v264_v44 }
  0x16   :  { %186 = vmatmul.mubr.bf16.vlgmr.msra.gmra.mrb[4].mxu0 %v293_v30  ;;  %227 = vmatmul.mubr.bf16.vlgmr.msra.gmra.mrb[4].mxu1 %v295_v33 }
  0x17   :  { %274 = vadd.xlane.f32.xlu0 %v273_v45 }
  0x9f   :  { %v266_v48 = vpop.xlane.xlu0 %265 }
  0xa0   :  { %v276_v49 = vadd.f32 %v266_v48, %v240_v47 }
  0xa2   :  { %279 = vst.msk [vmem:[%s379_s2] sm:$0xff] %vm18_vm0, %v276_v49 }
  0xa4   :  { %v275_v51 = vpop.xlane.xlu0 %274 }
  0xa5   :  { %v277_v52 = vadd.f32 %v275_v51, %v241_v50 }
  0xa7   :  { %280 = vst.msk [vmem:[%s379_s2 + $0x8] sm:$0xff] %vm18_vm0, %v277_v52 }
  0xe1   :  { %v105_v53 = vpop.f32.mrb[0].mxu0  ;;  %v146_v54 = vpop.f32.mrb[0].mxu1 }
  0xe2   :  { %v107_v55 = vpop.f32.mrb[1].mxu0  ;;  %v147_v56 = vadd.f32 %v146_v54, %v105_v53  ;;  %v148_v57 = vpop.f32.mrb[1].mxu1 }
  0xe3   :  { %v108_v58 = vpop.f32.mrb[2].mxu0  ;;  %v149_v59 = vpop.f32.mrb[2].mxu1 }
  0xe4   :  { %v110_v60 = vpop.f32.mrb[3].mxu0  ;;  %v150_v61 = vadd.f32 %v149_v59, %v108_v58  ;;  %v151_v62 = vpop.f32.mrb[3].mxu1 }
  0xe9   :  { %v187_v63 = vpop.f32.mrb[4].mxu0  ;;  %v228_v1 = vpop.f32.mrb[4].mxu1 }
  0xea   :  { %v188_v0 = vadd.f32 %v187_v63, %v147_v56  ;;  %v189_v2 = vpop.f32.mrb[5].mxu0  ;;  %v230_v4 = vpop.f32.mrb[5].mxu1 }
  0xeb   :  { %v190_v5 = vpop.f32.mrb[6].mxu0  ;;  %v231_v8 = vpop.f32.mrb[6].mxu1 }
  0xec   :  { %v229_v6 = vadd.f32 %v228_v1, %v188_v0  ;;  %v191_v7 = vadd.f32 %v190_v5, %v150_v61  ;;  %v192_v9 = vpop.f32.mrb[7].mxu0  ;;  %v233_v11 = vpop.f32.mrb[7].mxu1 }
  0xee   :  { %v235_v12 = vadd.f32 %v229_v6, %v29_v3  ;;  %v232_v13 = vadd.f32 %v231_v8, %v191_v7 }
  0xf0   :  { %238 = vst.msk [vmem:[%s380_s1] sm:$0xff] %vm15_vm1, %v235_v12  ;;  %v236_v14 = vadd.f32 %v232_v13, %v30_v10 }
  0xf2   :  { %239 = vst.msk [vmem:[%s380_s1 + $0x8] sm:$0xff] %vm15_vm1, %v236_v14 }

// kernel: custom-call.67
= control target key start
LH: loop header
LB: loop body
LE: loop exit
PB: predicated region body
PF: predicated region fallthrough
CT: control target
= control target key end

     0   :  { %s352_s6 = smov 0   ;;  %s354_s7 = smov 0   ;;  %s399_s0 = inlined_call_operand.vmem [shape: f32[2,1,4,4], index: 0, kind: input, shape index: {}]   ;;  %s400_s1 = inlined_call_operand.vmem [shape: f32[2,1,4,4], index: 1, kind: output, shape index: {}]  }
   0x1   :  { %s356_s8 = smov 0  }
   0x2 LB: > { %s278_s9 = sadd.s32 4294967295, %s339_s8   ;;  %s33_s10 = sadd.s32 1, %s335_s7  ;;  %s339_s8 = sphi %s356_s8, %s7_s8   ;;  %s335_s7 = sphi %s354_s7, %s402_s7   ;;  %s331_s6 = sphi %s352_s6, %s401_s6  }
   0x3   : > { %p35_p0 = scmp.ge.s32.totalorder %s33_s10, 2  ;;  %p280_p1 = scmp.ge.s32.totalorder %s339_s8, 2 }
   0x4   : > { %s49_s11 = sand.u32 (!%p280_p1), 1, %s339_s8   ;;  %s282_s12 = sshll.u32 (!%p280_p1), %s335_s7, 2 }
   0x5   : > { %s404_s10 = smov (%p35_p0, %s33_s10), 0  ;;  %47 = sbr.rel (%p280_p1) target bundleno = 12 (0xc), region = 16 }
   0x6   : > { %s281_s13 = sshll.u32 (!%p280_p1), %s49_s11, 2  ;;  %s56_s16 = scalar_lea.vmem (!%p280_p1), %s399_s0, %s282_s12 }
   0x7   : > { %v72_v0 = vld [vmem:[%s56_s16] sm:$0xf] (!%p280_p1)  ;;  %s51_s17 = scalar_lea.vmem (!%p280_p1), [#allocation1], %s281_s13 }
   0x8   : > { %73 = vst [vmem:[%s51_s17] sm:$0xf] (!%p280_p1), %v72_v0 }
   0xc PF: > { %p283_p2 = scmp.ge.s32.totalorder %s339_s8, 1  ;;  %p89_p3 = scmp.lt.s32.totalorder %s339_s8, 3 }
   0xe   : > { %p90_p4 = pnand %p283_p2, %p89_p3 }
  0x10   : > { %93 = sbr.rel (%p90_p4) target bundleno = 656 (0x290), region = 50 }
  0x17   : > { %s379_s18 = sand.u32 1, %s278_s9   ;;  %v111_v1 = vlaneseq  ;;  %v341_v11 = vmov -1.0   ;;  %s287_s22 = sshll.u32 %s331_s6, 2 }
  0x18   : > { %s284_s19 = sshll.u32 %s379_s18, 2  ;;  %s187_s25 = scalar_lea.vmem %s400_s1, %s287_s22 }
  0x19   : > { %s102_s20 = scalar_lea.vmem [#allocation1], %s284_s19  ;;  %v112_v3 = vand.u32 127, %v111_v1  ;;  %v115_v4 = vshrl.u32 %v111_v1, 7  ;;  %s106_s21 = scalar_lea.vmem [#allocation3], %s284_s19 }
  0x1a   : > { %v109_v2 = vld [vmem:[%s102_s20] sm:$0xf] }
  0x1b   : > { %110 = vst [vmem:[#allocation0] sm:$0xf] %v109_v2  ;;  %vm113_vm0 = vcmp.lt.s32.totalorder %v112_v3, 4  ;;  %vm122_vm1 = vcmp.le.s32.totalorder %v115_v4, %v112_v3  ;;  %vm117_vm2 = vcmp.eq.s32.totalorder %v115_v4, %v112_v3  ;;  %vm136_vm4 = vcmp.eq.s32.totalorder %v112_v3, 3 }
  0x1c   : > { %vm123_vm3 = vmand %vm122_vm1, %vm113_vm0  ;;  %vm133_vm5 = vcmp.eq.s32.totalorder %v112_v3, %v115_v4  ;;  %v137_v12 = vsel %vm136_vm4, 1.0, %v341_v11  ;;  %vm144_vm6 = vcmp.eq.s32.totalorder %v112_v3, 2  ;;  %vm154_vm7 = vcmp.eq.s32.totalorder %v112_v3, 1 }
  0x1d   : > { %v138_v13 = vsel %vm133_vm5, %v137_v12, 0.0  ;;  %vm163_vm8 = vcmp.eq.s32.totalorder %v112_v3, 0 }
  0x22   : > { %v118_v5 = vld [vmem:[#allocation0] sm:$0xff] }
  0x23   : > { %v119_v6 = vsel %vm117_vm2, %v118_v5, 0.0  ;;  %v124_v7 = vsel %vm123_vm3, %v118_v5, 0.0 }
  0x24   : > { %120 = vadd.xlane.f32.xlu0 %v119_v6 }
  0xb1   : > { %v121_v8 = vpop.xlane.xlu0 %120 }
  0xb2   : > { %315 = vrcp.f32 %v121_v8  ;;  %vm170_vm9 = vweird.f32 %v121_v8 }
  0xbc   : > { %v316_v9 = vpop.eup %315 }
  0xbd   : > { %v126_v10 = vmul.f32 %v316_v9, %v124_v7 }
  0xbf   : > { %127 = vst [vmem:[#allocation4] sm:$0xff] %v126_v10 }
  0xc6   : > { %v140_v14 = vld [vmem:[#allocation4 + $0x2] ss:$0 sm:$0xff]  ;;  %v150_v17 = vld [vmem:[#allocation4 + $0x1] ss:$0 sm:$0xff]  ;;  %v159_v22 = vld [vmem:[#allocation4] ss:$0 sm:$0xff] }
  0xc7   : > { %v141_v15 = vxor.u32 2147483648, %v140_v14  ;;  %v151_v19 = vxor.u32 2147483648, %v150_v17  ;;  %v160_v24 = vxor.u32 2147483648, %v159_v22 }
  0xc9   : > { %v145_v16 = vmul.f32 %v141_v15, %v138_v13 }
  0xcb   : > { %146 = vadd.xlane.f32.xlu0 %v145_v16 }
 0x158   : > { %v147_v18 = vpop.xlane.xlu0 %146 }
 0x159   : > { %v148_v20 = vsel %vm144_vm6, %v147_v18, %v138_v13 }
 0x15a   : > { %v155_v21 = vmul.f32 %v151_v19, %v148_v20 }
 0x15c   : > { %156 = vadd.xlane.f32.xlu1 %v155_v21 }
 0x1e9   : > { %v157_v23 = vpop.xlane.xlu1 %156 }
 0x1ea   : > { %v158_v25 = vsel %vm154_vm7, %v157_v23, %v148_v20 }
 0x1eb   : > { %v164_v26 = vmul.f32 %v160_v24, %v158_v25 }
 0x1ed   : > { %165 = vadd.xlane.f32.xlu1 %v164_v26 }
 0x27a   : > { %v166_v27 = vpop.xlane.xlu1 %165 }
 0x27b   : > { %v167_v28 = vsel %vm163_vm8, %v166_v27, %v158_v25 }
 0x27c   : > { %v169_v29 = vmul.f32 %v316_v9, %v167_v28 }
 0x27e   : > { %v171_v30 = vsel %vm170_vm9, %v167_v28, %v169_v29 }
 0x27f   : > { %172 = vst [vmem:[#allocation2] sm:$0xff] %v171_v30 }
 0x286   : > { %v176_v31 = vld [vmem:[#allocation2] sm:$0xf] }
 0x287   : > { %178 = vst [vmem:[%s106_s21] sm:$0xf] %v176_v31 }
 0x28e   : > { %v203_v32 = vld [vmem:[%s106_s21] sm:$0xf] }
 0x28f   : > { %204 = vst [vmem:[%s187_s25] sm:$0xf] %v203_v32 }
 0x290 PF: > { %s7_s8 = sadd.s32 1, %s339_s8   ;;  %s401_s6 = smov %s335_s7 }
 0x291   : > { %p4_p5 = scmp.ge.s32.totalorder %s7_s8, 4   ;;  %s402_s7 = smov %s404_s10 }
 0x293   :  { %6 = sbr.rel (!%p4_p5) target bundleno = 2 (0x2), region = 112 }

// kernel: custom-call.71
= control target key start
LH: loop header
LB: loop body
LE: loop exit
PB: predicated region body
PF: predicated region fallthrough
CT: control target
= control target key end

     0   :  { %s367_s6 = smov 0   ;;  %s369_s7 = smov 0   ;;  %s414_s0 = inlined_call_operand.vmem [shape: f32[2,4,4], index: 0, kind: input, shape index: {}]   ;;  %s415_s1 = inlined_call_operand.vmem [shape: f32[2,4,4], index: 1, kind: output, shape index: {}]  }
   0x1   :  { %s371_s8 = smov 0  }
   0x2 LB: > { %s287_s9 = sadd.s32 4294967295, %s354_s8   ;;  %s26_s10 = sadd.s32 1, %s350_s7  ;;  %s354_s8 = sphi %s371_s8, %s7_s8   ;;  %s350_s7 = sphi %s369_s7, %s417_s7   ;;  %s346_s6 = sphi %s367_s6, %s416_s6  }
   0x3   : > { %p28_p0 = scmp.ge.s32.totalorder %s26_s10, 2  ;;  %p289_p1 = scmp.ge.s32.totalorder %s354_s8, 2 }
   0x4   : > { %s42_s11 = sand.u32 (!%p289_p1), 1, %s354_s8   ;;  %s291_s12 = sshll.u32 (!%p289_p1), %s350_s7, 2 }
   0x5   : > { %s419_s10 = smov (%p28_p0, %s26_s10), 0  ;;  %40 = sbr.rel (%p289_p1) target bundleno = 12 (0xc), region = 16 }
   0x6   : > { %s290_s13 = sshll.u32 (!%p289_p1), %s42_s11, 2  ;;  %s48_s16 = scalar_lea.vmem (!%p289_p1), %s414_s0, %s291_s12 }
   0x7   : > { %v64_v0 = vld [vmem:[%s48_s16] sm:$0xf] (!%p289_p1)  ;;  %s44_s17 = scalar_lea.vmem (!%p289_p1), [#allocation1], %s290_s13 }
   0x8   : > { %65 = vst [vmem:[%s44_s17] sm:$0xf] (!%p289_p1), %v64_v0 }
   0xc PF: > { %p292_p2 = scmp.ge.s32.totalorder %s354_s8, 1  ;;  %p81_p3 = scmp.lt.s32.totalorder %s354_s8, 3 }
   0xe   : > { %p82_p4 = pnand %p292_p2, %p81_p3 }
   0xf   : > { %v356_v1 = vmov (!%p82_p4), 0.0   ;;  %s394_s18 = sand.u32 (!%p82_p4), 1, %s287_s9   ;;  %vm104_vm0 = vcmask (!%p82_p4), 7168   ;;  %vm122_vm1 = vcmask (!%p82_p4), 15368   ;;  %vm139_vm2 = vcmask (!%p82_p4), 1047553   ;;  %s296_s22 = sshll.u32 (!%p82_p4), %s346_s6, 2 }
  0x10   : > { %85 = sbr.rel (%p82_p4) target bundleno = 711 (0x2c7), region = 50  ;;  %103 = vst [vmem:[#allocation2] sm:$0xff] (!%p82_p4), %v356_v1  ;;  %s293_s19 = sshll.u32 (!%p82_p4), %s394_s18, 2  ;;  %vm140_vm3 = vmand (!%p82_p4), %vm122_vm1, %vm139_vm2  ;;  %vm144_vm4 = vcmask (!%p82_p4), 23568   ;;  %vm161_vm5 = vcmask (!%p82_p4), 1047554   ;;  %vm166_vm7 = vcmask (!%p82_p4), 31768  }
  0x11   : > { %s94_s20 = scalar_lea.vmem (!%p82_p4), [#allocation1], %s293_s19  ;;  %vm162_vm6 = vmand (!%p82_p4), %vm144_vm4, %vm161_vm5  ;;  %vm183_vm8 = vcmask (!%p82_p4), 1047555   ;;  %s98_s21 = scalar_lea.vmem (!%p82_p4), [#allocation3], %s293_s19 }
  0x12   : > { %v101_v5 = vld [vmem:[%s94_s20] sm:$0xf] (!%p82_p4)  ;;  %vm184_vm9 = vmand (!%p82_p4), %vm166_vm7, %vm183_vm8  ;;  %s201_s25 = scalar_lea.vmem (!%p82_p4), %s415_s1, %s296_s22 }
  0x13   : > { %102 = vst [vmem:[#allocation0] sm:$0xf] (!%p82_p4), %v101_v5 }
  0x17   : > { %v105_v2 = vld [vmem:[#allocation2] ss:$0 sm:$0xff] }
  0x18   : > { %v107_v3 = vmul.f32 %v105_v2, %v105_v2  ;;  %v114_v4 = vmul.f32 0.0, %v105_v2 }
  0x1a   : > { %108 = vadd.xlane.f32.xlu0 %v107_v3  ;;  %v106_v6 = vld [vmem:[#allocation0] ss:$0 sm:$0xff]  ;;  %v126_v18 = vld [vmem:[#allocation0 + $0x1] ss:$0 sm:$0xff]  ;;  %v148_v30 = vld [vmem:[#allocation0 + $0x2] ss:$0 sm:$0xff] }
  0x1b   : > { %v112_v10 = vld [vmem:[#allocation0] sm:$0xff] }
  0x1c   : > { %v170_v42 = vld [vmem:[#allocation0 + $0x3] ss:$0 sm:$0xff] }
  0x1e   : > { %115 = vadd.xlane.f32.xlu0 %v114_v4 }
  0xa7   : > { %v109_v7 = vpop.xlane.xlu0 %108 }
  0xa8   : > { %v110_v8 = vsub.f32 %v106_v6, %v109_v7 }
  0xaa   : > { %324 = vrsqrt.f32 %v110_v8 }
  0xab   : > { %v116_v9 = vpop.xlane.xlu0 %115 }
  0xac   : > { %v117_v11 = vsub.f32 %v112_v10, %v116_v9 }
  0xb4   : > { %v325_v12 = vpop.eup %324 }
  0xb5   : > { %v118_v13 = vmul.f32 %v325_v12, %v117_v11 }
  0xb7   : > { %v119_v14 = vsel %vm104_vm0, %v118_v13, 0.0 }
  0xb8   : > { %121 = vst [vmem:[#allocation2] sm:$0xff] %v119_v14 }
  0xbf   : > { %v124_v15 = vld [vmem:[#allocation2 + $0x1] ss:$0 sm:$0xff] }
  0xc0   : > { %v127_v16 = vmul.f32 %v124_v15, %v124_v15  ;;  %v134_v17 = vmul.f32 %v124_v15, %v119_v14 }
  0xc2   : > { %128 = vadd.xlane.f32.xlu1 %v127_v16 }
  0xc6   : > { %135 = vadd.xlane.f32.xlu1 %v134_v17 }
 0x14f   : > { %v129_v19 = vpop.xlane.xlu1 %128 }
 0x150   : > { %v130_v20 = vsub.f32 %v126_v18, %v129_v19 }
 0x152   : > { %326 = vrsqrt.f32 %v130_v20 }
 0x153   : > { %v136_v21 = vpop.xlane.xlu1 %135 }
 0x154   : > { %v137_v22 = vsub.f32 %v112_v10, %v136_v21 }
 0x15c   : > { %v327_v23 = vpop.eup %326 }
 0x15d   : > { %v138_v24 = vmul.f32 %v327_v23, %v137_v22 }
 0x15f   : > { %v141_v25 = vsel %vm140_vm3, %v138_v24, 0.0 }
 0x160   : > { %v142_v26 = vadd.f32 %v141_v25, %v119_v14 }
 0x162   : > { %143 = vst [vmem:[#allocation2] sm:$0xff] %v142_v26 }
 0x169   : > { %v146_v27 = vld [vmem:[#allocation2 + $0x2] ss:$0 sm:$0xff] }
 0x16a   : > { %v156_v28 = vmul.f32 %v146_v27, %v142_v26  ;;  %v149_v29 = vmul.f32 %v146_v27, %v146_v27 }
 0x16c   : > { %157 = vadd.xlane.f32.xlu1 %v156_v28  ;;  %150 = vadd.xlane.f32.xlu0 %v149_v29 }
 0x1f9   : > { %v151_v31 = vpop.xlane.xlu0 %150  ;;  %v158_v33 = vpop.xlane.xlu1 %157 }
 0x1fa   : > { %v152_v32 = vsub.f32 %v148_v30, %v151_v31  ;;  %v159_v34 = vsub.f32 %v112_v10, %v158_v33 }
 0x1fc   : > { %328 = vrsqrt.f32 %v152_v32 }
 0x206   : > { %v329_v35 = vpop.eup %328 }
 0x207   : > { %v160_v36 = vmul.f32 %v329_v35, %v159_v34 }
 0x209   : > { %v163_v37 = vsel %vm162_vm6, %v160_v36, 0.0 }
 0x20a   : > { %v164_v38 = vadd.f32 %v163_v37, %v142_v26 }
 0x20c   : > { %165 = vst [vmem:[#allocation2] sm:$0xff] %v164_v38 }
 0x213   : > { %v168_v39 = vld [vmem:[#allocation2 + $0x3] ss:$0 sm:$0xff] }
 0x214   : > { %v178_v40 = vmul.f32 %v168_v39, %v164_v38  ;;  %v171_v41 = vmul.f32 %v168_v39, %v168_v39 }
 0x216   : > { %179 = vadd.xlane.f32.xlu1 %v178_v40  ;;  %172 = vadd.xlane.f32.xlu0 %v171_v41 }
 0x2a3   : > { %v173_v43 = vpop.xlane.xlu0 %172  ;;  %v180_v45 = vpop.xlane.xlu1 %179 }
 0x2a4   : > { %v174_v44 = vsub.f32 %v170_v42, %v173_v43  ;;  %v181_v46 = vsub.f32 %v112_v10, %v180_v45 }
 0x2a6   : > { %330 = vrsqrt.f32 %v174_v44 }
 0x2b0   : > { %v331_v47 = vpop.eup %330 }
 0x2b1   : > { %v182_v48 = vmul.f32 %v331_v47, %v181_v46 }
 0x2b3   : > { %v185_v49 = vsel %vm184_vm9, %v182_v48, 0.0 }
 0x2b4   : > { %v186_v50 = vadd.f32 %v185_v49, %v164_v38 }
 0x2b6   : > { %187 = vst [vmem:[#allocation2] sm:$0xff] %v186_v50 }
 0x2bd   : > { %v191_v51 = vld [vmem:[#allocation2] sm:$0xf] }
 0x2be   : > { %193 = vst [vmem:[%s98_s21] sm:$0xf] %v191_v51 }
 0x2c5   : > { %v217_v52 = vld [vmem:[%s98_s21] sm:$0xf] }
 0x2c6   : > { %218 = vst [vmem:[%s201_s25] sm:$0xf] %v217_v52 }
 0x2c7 PF: > { %s7_s8 = sadd.s32 1, %s354_s8   ;;  %s416_s6 = smov %s350_s7 }
 0x2c8   : > { %p4_p5 = scmp.ge.s32.totalorder %s7_s8, 4   ;;  %s417_s7 = smov %s419_s10 }
 0x2ca   :  { %6 = sbr.rel (!%p4_p5) target bundleno = 2 (0x2), region = 116 }

</bundles_post_ra>
